<compile_context>
chip_gen: v5e
topology: v5e:2x2
jax: 0.10.0
libtpu: 0.0.40
codegen_flags: <defaults>
</compile_context>

<pallas_src>
import jax
import jax.numpy as jnp
from jax.experimental import pallas as pl
from jax.experimental.pallas import tpu as pltpu

BN_EPS = 1e-5
LANE = 128


def _pad_axis(x, target, axis):
    pad = target - x.shape[axis]
    if pad <= 0:
        return x
    widths = [(0, 0)] * x.ndim
    widths[axis] = (0, pad)
    return jnp.pad(x, widths)


def _im2col_patches(x_nchw):
    """NCHW -> (B*H*W, 9*Cin) im2col patch matrix for 3x3 / stride 1 / pad 1."""
    x = jnp.transpose(x_nchw, (0, 2, 3, 1))                  # NHWC (channels -> lanes)
    B, H, W, Cin = x.shape
    xp = jnp.pad(x, ((0, 0), (1, 1), (1, 1), (0, 0)))
    taps = [xp[:, kh:kh + H, kw:kw + W, :] for kh in range(3) for kw in range(3)]
    patches = jnp.concatenate(taps, axis=-1)                 # (B, H, W, 9*Cin)
    return patches.reshape(B * H * W, 9 * Cin)


# ---------------------------------------------------------------------------
# Fused kernel: [conv3x3 as im2col matmul -> BN2d -> ReLU -> GAP(matmul)]
#               -> [Linear -> BN1d -> ReLU -> Linear -> BN1d(affine=False)]
# One grid step per view (q-path / k-path); weights resident across steps.
# ---------------------------------------------------------------------------
def fused_mocov3_kernel(patch_ref, wconv_ref, g0_ref, b0_ref, pool_ref,
                        w1_ref, g1_ref, b1_ref, w2_ref,
                        emb_ref, out_ref):
    # --- base_encoder stem: single im2col matmul (K padded, lane-dense) ---
    z = jnp.dot(patch_ref[...], wconv_ref[...], preferred_element_type=jnp.float32)
    # BatchNorm2d (training): per-channel stats over all B*H*W rows, biased var.
    m0 = jnp.mean(z, axis=0, keepdims=True)
    c0 = z - m0
    v0 = jnp.mean(c0 * c0, axis=0, keepdims=True)
    y = jnp.maximum(c0 * jax.lax.rsqrt(v0 + BN_EPS) * g0_ref[...] + b0_ref[...], 0.0)
    # Global average pool as a matmul against the (B, B*H*W) pooling matrix.
    h = jnp.dot(pool_ref[...], y, preferred_element_type=jnp.float32)
    emb_ref[...] = h

    # --- projector ---
    z1 = jnp.dot(h, w1_ref[...], preferred_element_type=jnp.float32)
    m1 = jnp.mean(z1, axis=0, keepdims=True)
    c1 = z1 - m1
    v1 = jnp.mean(c1 * c1, axis=0, keepdims=True)
    a1 = jnp.maximum(c1 * jax.lax.rsqrt(v1 + BN_EPS) * g1_ref[...] + b1_ref[...], 0.0)

    z2 = jnp.dot(a1, w2_ref[...], preferred_element_type=jnp.float32)
    m2 = jnp.mean(z2, axis=0, keepdims=True)
    c2 = z2 - m2
    v2 = jnp.mean(c2 * c2, axis=0, keepdims=True)
    out_ref[...] = c2 * jax.lax.rsqrt(v2 + BN_EPS)           # affine=False


# ---------------------------------------------------------------------------
# MoCoV3 forward (single pallas_call, grid=(2,) over the two views)
# ---------------------------------------------------------------------------
def mocov3_forward(x_q, x_k, params):
    enc, prj = params["encoder"], params["projector"]

    B, Cin, H, W = x_q.shape
    hidden = enc["conv_w"].shape[-1]
    mlp_dim = prj["w1"].shape[1]
    dim = prj["w2"].shape[1]
    BHW = B * H * W
    k_raw = 9 * Cin

    # Lane-dense padded sizes (padding is exact: padded channels remain 0).
    KP = max(LANE, ((k_raw + 7) // 8) * 8)
    HP = max(LANE, hidden)
    MP = max(LANE, mlp_dim)
    DP = max(LANE, dim)

    # im2col patches for both views, stacked on a leading view axis.
    p_q = _pad_axis(_im2col_patches(x_q), KP, 1)
    p_k = _pad_axis(_im2col_patches(x_k), KP, 1)
    patches = jnp.stack([p_q, p_k], axis=0)                  # (2, BHW, KP)

    # Padded parameters.
    wc = _pad_axis(_pad_axis(enc["conv_w"].reshape(k_raw, hidden), KP, 0), HP, 1)
    g0 = _pad_axis(enc["bn_gamma"], HP, 1)
    b0 = _pad_axis(enc["bn_beta"], HP, 1)
    w1 = _pad_axis(_pad_axis(prj["w1"], HP, 0), MP, 1)
    g1 = _pad_axis(prj["g1"], MP, 1)
    b1 = _pad_axis(prj["b1"], MP, 1)
    w2 = _pad_axis(_pad_axis(prj["w2"], MP, 0), DP, 1)

    # Global-average-pool matrix: block-diagonal ones / (H*W).
    pool = jnp.kron(jnp.eye(B, dtype=jnp.float32),
                    jnp.ones((1, H * W), jnp.float32)) / float(H * W)

    const2 = lambda v: (0, 0)
    emb, proj = pl.pallas_call(
        fused_mocov3_kernel,
        out_shape=(jax.ShapeDtypeStruct((2, B, HP), jnp.float32),
                   jax.ShapeDtypeStruct((2, B, DP), jnp.float32)),
        grid=(2,),
        in_specs=[
            pl.BlockSpec((None, BHW, KP), lambda v: (v, 0, 0)),   # per-view patches
            pl.BlockSpec((KP, HP), const2),                       # conv weight (resident)
            pl.BlockSpec((1, HP), const2),                        # bn gamma
            pl.BlockSpec((1, HP), const2),                        # bn beta
            pl.BlockSpec((B, BHW), const2),                       # pooling matrix
            pl.BlockSpec((HP, MP), const2),                       # projector w1
            pl.BlockSpec((1, MP), const2),                        # g1
            pl.BlockSpec((1, MP), const2),                        # b1
            pl.BlockSpec((MP, DP), const2),                       # projector w2
        ],
        out_specs=(
            pl.BlockSpec((None, B, HP), lambda v: (v, 0, 0)),     # embedding per view
            pl.BlockSpec((None, B, DP), lambda v: (v, 0, 0)),     # projected per view
        ),
        compiler_params=pltpu.CompilerParams(
            dimension_semantics=("parallel",)),                   # 2 TCs on v7x
    )(patches, wc, g0, b0, pool, w1, g1, b1, w2)

    q = proj[0, :, :dim]
    k = proj[1, :, :dim]
    key_embedding = emb[1, :, :hidden]
    return q, k, key_embedding


# ---------------------------------------------------------------------------
# Pure-JAX reference (for a sanity check in __main__)
# ---------------------------------------------------------------------------
def _reference_forward(x_q, x_k, params):
    enc, prj = params["encoder"], params["projector"]
    P = jax.lax.Precision.HIGHEST

    def bn(x, gamma=None, beta=None):
        m = jnp.mean(x, axis=0, keepdims=True)
        v = jnp.mean((x - m) ** 2, axis=0, keepdims=True)
        y = (x - m) * jax.lax.rsqrt(v + BN_EPS)
        if gamma is not None:
            y = y * gamma + beta
        return y

    def encode(x):
        B, Cin, H, W = x.shape
        patches = _im2col_patches(x)
        w2d = enc["conv_w"].reshape(9 * Cin, -1)
        z = jnp.dot(patches, w2d, precision=P)
        y = jnp.maximum(bn(z, enc["bn_gamma"], enc["bn_beta"]), 0.0)
        return jnp.mean(y.reshape(B, H * W, -1), axis=1)

    def project(h):
        a1 = jnp.maximum(bn(jnp.dot(h, prj["w1"], precision=P), prj["g1"], prj["b1"]), 0.0)
        return bn(jnp.dot(a1, prj["w2"], precision=P))

    h_q = encode(x_q)
    h_k = encode(x_k)
    return project(h_q), project(h_k), h_k


def init_params(key, c_in, hidden_dim, mlp_dim, dim):
    ks = jax.random.split(key, 3)
    # Linear weights stored as (in, out) == PyTorch W.T; deterministic init.
    return {
        "encoder": {
            "conv_w": 0.05 * jax.random.normal(ks[0], (3, 3, c_in, hidden_dim), jnp.float32),
            "bn_gamma": jnp.ones((1, hidden_dim), jnp.float32),
            "bn_beta": jnp.zeros((1, hidden_dim), jnp.float32),
        },
        "projector": {
            "w1": 0.05 * jax.random.normal(ks[1], (hidden_dim, mlp_dim), jnp.float32),
            "g1": jnp.ones((1, mlp_dim), jnp.float32),
            "b1": jnp.zeros((1, mlp_dim), jnp.float32),
            "w2": 0.05 * jax.random.normal(ks[2], (mlp_dim, dim), jnp.float32),
        },
    }


if __name__ == "__main__":
    B, C_IN, H, W = 2, 4, 16, 16       # small image views (NCHW, like PyTorch)
    HIDDEN_DIM = 32                    # base_encoder output feature dim
    MLP_DIM = 64                       # projector hidden dim
    DIM = 16                           # MoCo feature dim

    key = jax.random.PRNGKey(0)
    k_param, k_xq, k_xk = jax.random.split(key, 3)

    params = init_params(k_param, C_IN, HIDDEN_DIM, MLP_DIM, DIM)
    x_q = jax.random.normal(k_xq, (B, C_IN, H, W), jnp.float32)
    x_k = jax.random.normal(k_xk, (B, C_IN, H, W), jnp.float32)

    q, k, key_embedding = jax.jit(mocov3_forward)(x_q, x_k, params)
    jax.block_until_ready((q, k, key_embedding))

    assert q.shape == (B, DIM)
    assert k.shape == (B, DIM)
    assert key_embedding.shape == (B, HIDDEN_DIM)
    assert all(bool(jnp.all(jnp.isfinite(t))) for t in (q, k, key_embedding))

    # Sanity check against a pure-JAX reference (loose tol for MXU rounding).
    q_r, k_r, e_r = _reference_forward(x_q, x_k, params)
    assert bool(jnp.allclose(q, q_r, atol=2e-2, rtol=2e-2))
    assert bool(jnp.allclose(k, k_r, atol=2e-2, rtol=2e-2))
    assert bool(jnp.allclose(key_embedding, e_r, atol=2e-2, rtol=2e-2))

    print("KERNEL_OK")
</pallas_src>

<mosaic_0001>
module attributes {stable_mosaic.version = 11 : i64} {
  func.func @fused_mocov3_kernel(%arg0: i32, %arg1: memref<1x512x128xf32, #tpu.memory_space<vmem>>, %arg2: memref<128x128xf32, #tpu.memory_space<vmem>>, %arg3: memref<1x128xf32, #tpu.memory_space<vmem>>, %arg4: memref<1x128xf32, #tpu.memory_space<vmem>>, %arg5: memref<2x512xf32, #tpu.memory_space<vmem>>, %arg6: memref<128x128xf32, #tpu.memory_space<vmem>>, %arg7: memref<1x128xf32, #tpu.memory_space<vmem>>, %arg8: memref<1x128xf32, #tpu.memory_space<vmem>>, %arg9: memref<128x128xf32, #tpu.memory_space<vmem>>, %arg10: memref<1x2x128xf32, #tpu.memory_space<vmem>>, %arg11: memref<1x2x128xf32, #tpu.memory_space<vmem>>) attributes {dimension_semantics = [#tpu.dimension_semantics<parallel>], iteration_bounds = array<i64: 2>, scalar_prefetch = 0 : i64, scratch_operands = 0 : i64, tpu.core_type = #tpu.core_type<tc>, window_params = [{transform_indices = @transform_0, window_bounds = array<i64: 1, 512, 128>}, {pipeline_mode = #tpu.pipeline_mode<synchronous>, transform_indices = @transform_1, window_bounds = array<i64: 128, 128>}, {pipeline_mode = #tpu.pipeline_mode<synchronous>, transform_indices = @transform_2, window_bounds = array<i64: 1, 128>}, {pipeline_mode = #tpu.pipeline_mode<synchronous>, transform_indices = @transform_3, window_bounds = array<i64: 1, 128>}, {pipeline_mode = #tpu.pipeline_mode<synchronous>, transform_indices = @transform_4, window_bounds = array<i64: 2, 512>}, {pipeline_mode = #tpu.pipeline_mode<synchronous>, transform_indices = @transform_5, window_bounds = array<i64: 128, 128>}, {pipeline_mode = #tpu.pipeline_mode<synchronous>, transform_indices = @transform_6, window_bounds = array<i64: 1, 128>}, {pipeline_mode = #tpu.pipeline_mode<synchronous>, transform_indices = @transform_7, window_bounds = array<i64: 1, 128>}, {pipeline_mode = #tpu.pipeline_mode<synchronous>, transform_indices = @transform_8, window_bounds = array<i64: 128, 128>}, {transform_indices = @transform_9, window_bounds = array<i64: 1, 2, 128>}, {transform_indices = @transform_10, window_bounds = array<i64: 1, 2, 128>}]} {
    %c0 = arith.constant 0 : index
    %c0_0 = arith.constant 0 : index
    %c0_1 = arith.constant 0 : index
    %0 = vector.load %arg1[%c0, %c0_0, %c0_1] : memref<1x512x128xf32, #tpu.memory_space<vmem>>, vector<1x512x128xf32>
    %1 = vector.shape_cast %0 : vector<1x512x128xf32> to vector<512x128xf32>
    %c0_2 = arith.constant 0 : index
    %c0_3 = arith.constant 0 : index
    %2 = vector.load %arg2[%c0_2, %c0_3] : memref<128x128xf32, #tpu.memory_space<vmem>>, vector<128x128xf32>
    %cst = arith.constant dense<0.000000e+00> : vector<512x128xf32>
    %3 = tpu.matmul %1, %2, %cst {dimension_numbers = #tpu.dot_dimension_numbers<[1], [0], [0], [1], [0, 0, 1, 1], [], []>} : vector<512x128xf32>, vector<128x128xf32>, vector<512x128xf32> -> vector<512x128xf32>
    %cst_4 = arith.constant dense<0.000000e+00> : vector<128xf32>
    %4 = vector.multi_reduction <add>, %3, %cst_4 [0] : vector<512x128xf32> to vector<128xf32>
    %5 = vector.shape_cast %4 : vector<128xf32> to vector<1x128xf32>
    %cst_5 = arith.constant 5.120000e+02 : f32
    %6 = vector.broadcast %cst_5 : f32 to vector<1x128xf32>
    %7 = arith.divf %5, %6 : vector<1x128xf32>
    %8 = vector.broadcast %7 : vector<1x128xf32> to vector<512x128xf32>
    %9 = arith.subf %3, %8 : vector<512x128xf32>
    %10 = arith.mulf %9, %9 : vector<512x128xf32>
    %cst_6 = arith.constant dense<0.000000e+00> : vector<128xf32>
    %11 = vector.multi_reduction <add>, %10, %cst_6 [0] : vector<512x128xf32> to vector<128xf32>
    %12 = vector.shape_cast %11 : vector<128xf32> to vector<1x128xf32>
    %cst_7 = arith.constant 5.120000e+02 : f32
    %13 = vector.broadcast %cst_7 : f32 to vector<1x128xf32>
    %14 = arith.divf %12, %13 : vector<1x128xf32>
    %cst_8 = arith.constant 9.99999974E-6 : f32
    %15 = vector.broadcast %cst_8 : f32 to vector<1x128xf32>
    %16 = arith.addf %14, %15 : vector<1x128xf32>
    %17 = math.rsqrt %16 : vector<1x128xf32>
    %18 = vector.broadcast %17 : vector<1x128xf32> to vector<512x128xf32>
    %19 = arith.mulf %9, %18 : vector<512x128xf32>
    %c0_9 = arith.constant 0 : index
    %c0_10 = arith.constant 0 : index
    %20 = vector.load %arg3[%c0_9, %c0_10] : memref<1x128xf32, #tpu.memory_space<vmem>>, vector<1x128xf32>
    %21 = vector.broadcast %20 : vector<1x128xf32> to vector<512x128xf32>
    %22 = arith.mulf %19, %21 : vector<512x128xf32>
    %c0_11 = arith.constant 0 : index
    %c0_12 = arith.constant 0 : index
    %23 = vector.load %arg4[%c0_11, %c0_12] : memref<1x128xf32, #tpu.memory_space<vmem>>, vector<1x128xf32>
    %24 = vector.broadcast %23 : vector<1x128xf32> to vector<512x128xf32>
    %25 = arith.addf %22, %24 : vector<512x128xf32>
    %cst_13 = arith.constant 0.000000e+00 : f32
    %26 = vector.broadcast %cst_13 : f32 to vector<512x128xf32>
    %27 = arith.maximumf %25, %26 : vector<512x128xf32>
    %c0_14 = arith.constant 0 : index
    %c0_15 = arith.constant 0 : index
    %28 = vector.load %arg5[%c0_14, %c0_15] : memref<2x512xf32, #tpu.memory_space<vmem>>, vector<2x512xf32>
    %cst_16 = arith.constant dense<0.000000e+00> : vector<2x128xf32>
    %29 = tpu.matmul %28, %27, %cst_16 {dimension_numbers = #tpu.dot_dimension_numbers<[1], [0], [0], [1], [0, 0, 1, 1], [], []>} : vector<2x512xf32>, vector<512x128xf32>, vector<2x128xf32> -> vector<2x128xf32>
    %c0_17 = arith.constant 0 : index
    %c0_18 = arith.constant 0 : index
    %c0_19 = arith.constant 0 : index
    %30 = vector.load %arg10[%c0_17, %c0_18, %c0_19] : memref<1x2x128xf32, #tpu.memory_space<vmem>>, vector<1x2x128xf32>
    %31 = vector.shape_cast %30 : vector<1x2x128xf32> to vector<2x128xf32>
    %32 = vector.shape_cast %29 : vector<2x128xf32> to vector<1x2x128xf32>
    tpu.vector_store %arg10[%c0_17, %c0_18, %c0_19], %32 {strides = array<i32>} : memref<1x2x128xf32, #tpu.memory_space<vmem>>, vector<1x2x128xf32>,
    %c0_20 = arith.constant 0 : index
    %c0_21 = arith.constant 0 : index
    %33 = vector.load %arg6[%c0_20, %c0_21] : memref<128x128xf32, #tpu.memory_space<vmem>>, vector<128x128xf32>
    %cst_22 = arith.constant dense<0.000000e+00> : vector<2x128xf32>
    %34 = tpu.matmul %29, %33, %cst_22 {dimension_numbers = #tpu.dot_dimension_numbers<[1], [0], [0], [1], [0, 0, 1, 1], [], []>} : vector<2x128xf32>, vector<128x128xf32>, vector<2x128xf32> -> vector<2x128xf32>
    %cst_23 = arith.constant dense<0.000000e+00> : vector<128xf32>
    %35 = vector.multi_reduction <add>, %34, %cst_23 [0] : vector<2x128xf32> to vector<128xf32>
    %36 = vector.shape_cast %35 : vector<128xf32> to vector<1x128xf32>
    %cst_24 = arith.constant 2.000000e+00 : f32
    %37 = vector.broadcast %cst_24 : f32 to vector<1x128xf32>
    %38 = arith.divf %36, %37 : vector<1x128xf32>
    %39 = vector.broadcast %38 : vector<1x128xf32> to vector<2x128xf32>
    %40 = arith.subf %34, %39 : vector<2x128xf32>
    %41 = arith.mulf %40, %40 : vector<2x128xf32>
    %cst_25 = arith.constant dense<0.000000e+00> : vector<128xf32>
    %42 = vector.multi_reduction <add>, %41, %cst_25 [0] : vector<2x128xf32> to vector<128xf32>
    %43 = vector.shape_cast %42 : vector<128xf32> to vector<1x128xf32>
    %cst_26 = arith.constant 2.000000e+00 : f32
    %44 = vector.broadcast %cst_26 : f32 to vector<1x128xf32>
    %45 = arith.divf %43, %44 : vector<1x128xf32>
    %cst_27 = arith.constant 9.99999974E-6 : f32
    %46 = vector.broadcast %cst_27 : f32 to vector<1x128xf32>
    %47 = arith.addf %45, %46 : vector<1x128xf32>
    %48 = math.rsqrt %47 : vector<1x128xf32>
    %49 = vector.broadcast %48 : vector<1x128xf32> to vector<2x128xf32>
    %50 = arith.mulf %40, %49 : vector<2x128xf32>
    %c0_28 = arith.constant 0 : index
    %c0_29 = arith.constant 0 : index
    %51 = vector.load %arg7[%c0_28, %c0_29] : memref<1x128xf32, #tpu.memory_space<vmem>>, vector<1x128xf32>
    %52 = vector.broadcast %51 : vector<1x128xf32> to vector<2x128xf32>
    %53 = arith.mulf %50, %52 : vector<2x128xf32>
    %c0_30 = arith.constant 0 : index
    %c0_31 = arith.constant 0 : index
    %54 = vector.load %arg8[%c0_30, %c0_31] : memref<1x128xf32, #tpu.memory_space<vmem>>, vector<1x128xf32>
    %55 = vector.broadcast %54 : vector<1x128xf32> to vector<2x128xf32>
    %56 = arith.addf %53, %55 : vector<2x128xf32>
    %cst_32 = arith.constant 0.000000e+00 : f32
    %57 = vector.broadcast %cst_32 : f32 to vector<2x128xf32>
    %58 = arith.maximumf %56, %57 : vector<2x128xf32>
    %c0_33 = arith.constant 0 : index
    %c0_34 = arith.constant 0 : index
    %59 = vector.load %arg9[%c0_33, %c0_34] : memref<128x128xf32, #tpu.memory_space<vmem>>, vector<128x128xf32>
    %cst_35 = arith.constant dense<0.000000e+00> : vector<2x128xf32>
    %60 = tpu.matmul %58, %59, %cst_35 {dimension_numbers = #tpu.dot_dimension_numbers<[1], [0], [0], [1], [0, 0, 1, 1], [], []>} : vector<2x128xf32>, vector<128x128xf32>, vector<2x128xf32> -> vector<2x128xf32>
    %cst_36 = arith.constant dense<0.000000e+00> : vector<128xf32>
    %61 = vector.multi_reduction <add>, %60, %cst_36 [0] : vector<2x128xf32> to vector<128xf32>
    %62 = vector.shape_cast %61 : vector<128xf32> to vector<1x128xf32>
    %cst_37 = arith.constant 2.000000e+00 : f32
    %63 = vector.broadcast %cst_37 : f32 to vector<1x128xf32>
    %64 = arith.divf %62, %63 : vector<1x128xf32>
    %65 = vector.broadcast %64 : vector<1x128xf32> to vector<2x128xf32>
    %66 = arith.subf %60, %65 : vector<2x128xf32>
    %67 = arith.mulf %66, %66 : vector<2x128xf32>
    %cst_38 = arith.constant dense<0.000000e+00> : vector<128xf32>
    %68 = vector.multi_reduction <add>, %67, %cst_38 [0] : vector<2x128xf32> to vector<128xf32>
    %69 = vector.shape_cast %68 : vector<128xf32> to vector<1x128xf32>
    %cst_39 = arith.constant 2.000000e+00 : f32
    %70 = vector.broadcast %cst_39 : f32 to vector<1x128xf32>
    %71 = arith.divf %69, %70 : vector<1x128xf32>
    %cst_40 = arith.constant 9.99999974E-6 : f32
    %72 = vector.broadcast %cst_40 : f32 to vector<1x128xf32>
    %73 = arith.addf %71, %72 : vector<1x128xf32>
    %74 = math.rsqrt %73 : vector<1x128xf32>
    %75 = vector.broadcast %74 : vector<1x128xf32> to vector<2x128xf32>
    %76 = arith.mulf %66, %75 : vector<2x128xf32>
    %c0_41 = arith.constant 0 : index
    %c0_42 = arith.constant 0 : index
    %c0_43 = arith.constant 0 : index
    %77 = vector.load %arg11[%c0_41, %c0_42, %c0_43] : memref<1x2x128xf32, #tpu.memory_space<vmem>>, vector<1x2x128xf32>
    %78 = vector.shape_cast %77 : vector<1x2x128xf32> to vector<2x128xf32>
    %79 = vector.shape_cast %76 : vector<2x128xf32> to vector<1x2x128xf32>
    tpu.vector_store %arg11[%c0_41, %c0_42, %c0_43], %79 {strides = array<i32>} : memref<1x2x128xf32, #tpu.memory_space<vmem>>, vector<1x2x128xf32>,
    return
  }
  func.func @transform_0(%arg0: i32) -> (i32, i32, i32) {
    %c0_i32 = arith.constant 0 : i32
    %c0_i32_0 = arith.constant 0 : i32
    %c0_i32_1 = arith.constant 0 : i32
    return %arg0, %c0_i32, %c0_i32_0 : i32, i32, i32
  }
  func.func @transform_1(%arg0: i32) -> (i32, i32) {
    %c0_i32 = arith.constant 0 : i32
    %c0_i32_0 = arith.constant 0 : i32
    %c0_i32_1 = arith.constant 0 : i32
    return %c0_i32, %c0_i32_0 : i32, i32
  }
  func.func @transform_2(%arg0: i32) -> (i32, i32) {
    %c0_i32 = arith.constant 0 : i32
    %c0_i32_0 = arith.constant 0 : i32
    %c0_i32_1 = arith.constant 0 : i32
    return %c0_i32, %c0_i32_0 : i32, i32
  }
  func.func @transform_3(%arg0: i32) -> (i32, i32) {
    %c0_i32 = arith.constant 0 : i32
    %c0_i32_0 = arith.constant 0 : i32
    %c0_i32_1 = arith.constant 0 : i32
    return %c0_i32, %c0_i32_0 : i32, i32
  }
  func.func @transform_4(%arg0: i32) -> (i32, i32) {
    %c0_i32 = arith.constant 0 : i32
    %c0_i32_0 = arith.constant 0 : i32
    %c0_i32_1 = arith.constant 0 : i32
    return %c0_i32, %c0_i32_0 : i32, i32
  }
  func.func @transform_5(%arg0: i32) -> (i32, i32) {
    %c0_i32 = arith.constant 0 : i32
    %c0_i32_0 = arith.constant 0 : i32
    %c0_i32_1 = arith.constant 0 : i32
    return %c0_i32, %c0_i32_0 : i32, i32
  }
  func.func @transform_6(%arg0: i32) -> (i32, i32) {
    %c0_i32 = arith.constant 0 : i32
    %c0_i32_0 = arith.constant 0 : i32
    %c0_i32_1 = arith.constant 0 : i32
    return %c0_i32, %c0_i32_0 : i32, i32
  }
  func.func @transform_7(%arg0: i32) -> (i32, i32) {
    %c0_i32 = arith.constant 0 : i32
    %c0_i32_0 = arith.constant 0 : i32
    %c0_i32_1 = arith.constant 0 : i32
    return %c0_i32, %c0_i32_0 : i32, i32
  }
  func.func @transform_8(%arg0: i32) -> (i32, i32) {
    %c0_i32 = arith.constant 0 : i32
    %c0_i32_0 = arith.constant 0 : i32
    %c0_i32_1 = arith.constant 0 : i32
    return %c0_i32, %c0_i32_0 : i32, i32
  }
  func.func @transform_9(%arg0: i32) -> (i32, i32, i32) {
    %c0_i32 = arith.constant 0 : i32
    %c0_i32_0 = arith.constant 0 : i32
    %c0_i32_1 = arith.constant 0 : i32
    return %arg0, %c0_i32, %c0_i32_0 : i32, i32, i32
  }
  func.func @transform_10(%arg0: i32) -> (i32, i32, i32) {
    %c0_i32 = arith.constant 0 : i32
    %c0_i32_0 = arith.constant 0 : i32
    %c0_i32_1 = arith.constant 0 : i32
    return %arg0, %c0_i32, %c0_i32_0 : i32, i32, i32
  }
}

</mosaic_0001>

<bundles_post_ra>
// kernel: mocov3_forward.1
= control target key start
LH: loop header
LB: loop body
LE: loop exit
PB: predicated region body
PF: predicated region fallthrough
CT: control target
= control target key end

     0   :  { %s1685_s13 = smov 0   ;;  %s2922_s0 = inlined_call_operand.vmem [shape: f32[2,512,128], index: 0, kind: input, shape index: {}]   ;;  %s2923_s1 = inlined_call_operand.vmem [shape: f32[128,128], index: 1, kind: input, shape index: {}]   ;;  %s2924_s2 = inlined_call_operand.vmem [shape: f32[1,128], index: 2, kind: input, shape index: {}]   ;;  %s2925_s3 = inlined_call_operand.vmem [shape: f32[1,128], index: 3, kind: input, shape index: {}]   ;;  %s2926_s4 = inlined_call_operand.vmem [shape: f32[2,512], index: 4, kind: input, shape index: {}]   ;;  %s2927_s5 = inlined_call_operand.vmem [shape: f32[128,128], index: 5, kind: input, shape index: {}]   ;;  %s2928_s6 = inlined_call_operand.vmem [shape: f32[1,128], index: 6, kind: input, shape index: {}]   ;;  %s2929_s7 = inlined_call_operand.vmem [shape: f32[1,128], index: 7, kind: input, shape index: {}]   ;;  %s2930_s8 = inlined_call_operand.vmem [shape: f32[128,128], index: 8, kind: input, shape index: {}]   ;;  %s2931_s9 = inlined_call_operand.vmem [shape: f32[2,2,128], index: 9, kind: output, shape index: {0}]   ;;  %s2932_s10 = inlined_call_operand.vmem [shape: f32[2,2,128], index: 10, kind: output, shape index: {1}]  }
   0x1 LB: > { %s1536_s14 = sadd.s32 4294967295, %s1626_s13   ;;  %p1540_p0 = scmp.ge.s32.totalorder %s1626_s13, 1  ;;  %s1626_s13 = sphi %s1685_s13, %s21_s13  }
   0x2   : > { %p315_p1 = scmp.lt.s32.totalorder %s1626_s13, 3 }
   0x4   : > { %p316_p2 = pnand %p1540_p0, %p315_p1 }
   0x6   : > { %319 = sbr.rel (%p316_p2) target bundleno = 1187 (0x4a3), region = 56 }
   0xb   : > { %v448_v0 = vld [vmem:[%s2923_s1 + $0x78] sm:$0xff]  ;;  %v447_v1 = vld [vmem:[%s2923_s1 + $0x70] sm:$0xff]  ;;  %v446_v2 = vld [vmem:[%s2923_s1 + $0x68] sm:$0xff]  ;;  %p356_p3 = scmp.lt.s32.totalorder %s1536_s14, 1  ;;  %vm1336_vm4 = vcmask 1041408  }
   0xc   : > { %449 = vmatpush.msra.mxu0 %v448_v0  ;;  %1548 = vmatpush.msra.mxu1 %v448_v0  ;;  %v445_v3 = vld [vmem:[%s2923_s1 + $0x60] sm:$0xff]  ;;  %v444_v4 = vld [vmem:[%s2923_s1 + $0x58] sm:$0xff]  ;;  %v443_v5 = vld [vmem:[%s2923_s1 + $0x50] sm:$0xff] }
   0xd   : > { %1549 = vmatpush.msra.mxu2 %v448_v0  ;;  %1550 = vmatpush.msra.mxu3 %v448_v0  ;;  %v442_v6 = vld [vmem:[%s2923_s1 + $0x48] sm:$0xff]  ;;  %v441_v7 = vld [vmem:[%s2923_s1 + $0x40] sm:$0xff]  ;;  %v440_v8 = vld [vmem:[%s2923_s1 + $0x38] sm:$0xff]  ;;  %s3055_s14 = smov (!%p356_p3, %s1536_s14), 1 }
   0xe   : > { %450 = vmatpush.msra.mxu0 %v447_v1  ;;  %1551 = vmatpush.msra.mxu1 %v447_v1  ;;  %v439_v9 = vld [vmem:[%s2923_s1 + $0x30] sm:$0xff]  ;;  %v438_v10 = vld [vmem:[%s2923_s1 + $0x28] sm:$0xff]  ;;  %v437_v11 = vld [vmem:[%s2923_s1 + $0x20] sm:$0xff]  ;;  %s1547_s23 = sshll.u32 %s3055_s14, 9  ;;  %s1543_s17 = sshll.u32 %s3055_s14, 1 }
   0xf   : > { %1552 = vmatpush.msra.mxu2 %v447_v1  ;;  %1553 = vmatpush.msra.mxu3 %v447_v1  ;;  %v436_v12 = vld [vmem:[%s2923_s1 + $0x18] sm:$0xff]  ;;  %v435_v13 = vld [vmem:[%s2923_s1 + $0x10] sm:$0xff]  ;;  %v434_v14 = vld [vmem:[%s2923_s1 + $0x8] sm:$0xff]  ;;  %s1748_s30 = scalar_lea.vmem %s2922_s0, %s1547_s23  ;;  %s364_s20 = scalar_lea.vmem %s2931_s9, %s1543_s17 }
  0x10   : > { %451 = vmatpush.msra.mxu0 %v446_v2  ;;  %1554 = vmatpush.msra.mxu1 %v446_v2  ;;  %v433_v15 = vld [vmem:[%s2923_s1] sm:$0xff]  ;;  %v370_v17 = vld [vmem:[%s1748_s30 + $0x8] sm:$0xff]  ;;  %v371_v18 = vld [vmem:[%s1748_s30 + $0x10] sm:$0xff]  ;;  %s368_s25 = scalar_lea.vmem %s2932_s10, %s1543_s17 }
  0x11   : > { %1555 = vmatpush.msra.mxu2 %v446_v2  ;;  %1556 = vmatpush.msra.mxu3 %v446_v2  ;;  %v369_v16 = vld [vmem:[%s1748_s30] sm:$0xff]  ;;  %v372_v19 = vld [vmem:[%s1748_s30 + $0x18] sm:$0xff]  ;;  %v374_v22 = vld [vmem:[%s1748_s30 + $0x28] sm:$0xff] }
  0x12   : > { %452 = vmatpush.msra.mxu0 %v445_v3  ;;  %1557 = vmatpush.msra.mxu1 %v445_v3  ;;  %v373_v20 = vld [vmem:[%s1748_s30 + $0x20] sm:$0xff]  ;;  %v390_v23 = vld [vmem:[%s1748_s30 + $0xa8] sm:$0xff]  ;;  %v375_v24 = vld [vmem:[%s1748_s30 + $0x30] sm:$0xff] }
  0x13   : > { %1558 = vmatpush.msra.mxu2 %v445_v3  ;;  %1559 = vmatpush.msra.mxu3 %v445_v3  ;;  %v389_v21 = vld [vmem:[%s1748_s30 + $0xa0] sm:$0xff]  ;;  %v391_v25 = vld [vmem:[%s1748_s30 + $0xb0] sm:$0xff]  ;;  %v376_v26 = vld [vmem:[%s1748_s30 + $0x38] sm:$0xff] }
  0x14   : > { %453 = vmatpush.msra.mxu0 %v444_v4  ;;  %1560 = vmatpush.msra.mxu1 %v444_v4  ;;  %v392_v27 = vld [vmem:[%s1748_s30 + $0xb8] sm:$0xff]  ;;  %v377_v29 = vld [vmem:[%s1748_s30 + $0x40] sm:$0xff]  ;;  %v378_v32 = vld [vmem:[%s1748_s30 + $0x48] sm:$0xff] }
  0x15   : > { %1561 = vmatpush.msra.mxu2 %v444_v4  ;;  %1562 = vmatpush.msra.mxu3 %v444_v4  ;;  %v404_v28 = vld [vmem:[%s1748_s30 + $0x118] sm:$0xff]  ;;  %v393_v30 = vld [vmem:[%s1748_s30 + $0xc0] sm:$0xff]  ;;  %v394_v33 = vld [vmem:[%s1748_s30 + $0xc8] sm:$0xff] }
  0x16   : > { %454 = vmatpush.msra.mxu0 %v443_v5  ;;  %1563 = vmatpush.msra.mxu1 %v443_v5  ;;  %v405_v31 = vld [vmem:[%s1748_s30 + $0x120] sm:$0xff]  ;;  %v406_v34 = vld [vmem:[%s1748_s30 + $0x128] sm:$0xff]  ;;  %v379_v35 = vld [vmem:[%s1748_s30 + $0x50] sm:$0xff] }
  0x17   : > { %1564 = vmatpush.msra.mxu2 %v443_v5  ;;  %1565 = vmatpush.msra.mxu3 %v443_v5  ;;  %v395_v36 = vld [vmem:[%s1748_s30 + $0xd0] sm:$0xff]  ;;  %v380_v38 = vld [vmem:[%s1748_s30 + $0x58] sm:$0xff]  ;;  %v381_v39 = vld [vmem:[%s1748_s30 + $0x60] sm:$0xff] }
  0x18   : > { %455 = vmatpush.msra.mxu0 %v442_v6  ;;  %1566 = vmatpush.msra.mxu1 %v442_v6  ;;  %v407_v37 = vld [vmem:[%s1748_s30 + $0x130] sm:$0xff]  ;;  %v396_v40 = vld [vmem:[%s1748_s30 + $0xd8] sm:$0xff]  ;;  %v382_v43 = vld [vmem:[%s1748_s30 + $0x68] sm:$0xff] }
  0x19   : > { %1567 = vmatpush.msra.mxu2 %v442_v6  ;;  %1568 = vmatpush.msra.mxu3 %v442_v6  ;;  %v408_v41 = vld [vmem:[%s1748_s30 + $0x138] sm:$0xff]  ;;  %v419_v42 = vld [vmem:[%s1748_s30 + $0x190] sm:$0xff]  ;;  %v397_v44 = vld [vmem:[%s1748_s30 + $0xe0] sm:$0xff] }
  0x1a   : > { %456 = vmatpush.msra.mxu0 %v441_v7  ;;  %1569 = vmatpush.msra.mxu1 %v441_v7  ;;  %v409_v45 = vld [vmem:[%s1748_s30 + $0x140] sm:$0xff]  ;;  %v420_v46 = vld [vmem:[%s1748_s30 + $0x198] sm:$0xff]  ;;  %v383_v47 = vld [vmem:[%s1748_s30 + $0x70] sm:$0xff] }
  0x1b   : > { %1570 = vmatpush.msra.mxu2 %v441_v7  ;;  %1571 = vmatpush.msra.mxu3 %v441_v7  ;;  %v398_v48 = vld [vmem:[%s1748_s30 + $0xe8] sm:$0xff]  ;;  %v421_v50 = vld [vmem:[%s1748_s30 + $0x1a0] sm:$0xff]  ;;  %v384_v51 = vld [vmem:[%s1748_s30 + $0x78] sm:$0xff] }
  0x1c   : > { %457 = vmatpush.msra.mxu0 %v440_v8  ;;  %1572 = vmatpush.msra.mxu1 %v440_v8  ;;  %v410_v49 = vld [vmem:[%s1748_s30 + $0x148] sm:$0xff]  ;;  %v399_v52 = vld [vmem:[%s1748_s30 + $0xf0] sm:$0xff]  ;;  %v385_v56 = vld [vmem:[%s1748_s30 + $0x80] sm:$0xff] }
  0x1d   : > { %1573 = vmatpush.msra.mxu2 %v440_v8  ;;  %1574 = vmatpush.msra.mxu3 %v440_v8  ;;  %v411_v53 = vld [vmem:[%s1748_s30 + $0x150] sm:$0xff]  ;;  %v422_v54 = vld [vmem:[%s1748_s30 + $0x1a8] sm:$0xff]  ;;  %v400_v57 = vld [vmem:[%s1748_s30 + $0xf8] sm:$0xff] }
  0x1e   : > { %458 = vmatpush.msra.mxu0 %v439_v9  ;;  %1575 = vmatpush.msra.mxu1 %v439_v9  ;;  %v412_v58 = vld [vmem:[%s1748_s30 + $0x158] sm:$0xff]  ;;  %v423_v59 = vld [vmem:[%s1748_s30 + $0x1b0] sm:$0xff]  ;;  %v386_v61 = vld [vmem:[%s1748_s30 + $0x88] sm:$0xff] }
  0x1f   : > { %1576 = vmatpush.msra.mxu2 %v439_v9  ;;  %1577 = vmatpush.msra.mxu3 %v439_v9  ;;  %v401_v62 = vld [vmem:[%s1748_s30 + $0x100] sm:$0xff]  ;;  %v424_v0 = vld [vmem:[%s1748_s30 + $0x1b8] sm:$0xff]  ;;  %v387_v2 = vld [vmem:[%s1748_s30 + $0x90] sm:$0xff] }
  0x20   : > { %459 = vmatpush.msra.mxu0 %v438_v10  ;;  %1578 = vmatpush.msra.mxu1 %v438_v10  ;;  %v413_v63 = vld [vmem:[%s1748_s30 + $0x160] sm:$0xff]  ;;  %v402_v3 = vld [vmem:[%s1748_s30 + $0x108] sm:$0xff]  ;;  %v388_v7 = vld [vmem:[%s1748_s30 + $0x98] sm:$0xff] }
  0x21   : > { %1579 = vmatpush.msra.mxu2 %v438_v10  ;;  %1580 = vmatpush.msra.mxu3 %v438_v10  ;;  %v414_v4 = vld [vmem:[%s1748_s30 + $0x168] sm:$0xff]  ;;  %v425_v5 = vld [vmem:[%s1748_s30 + $0x1c0] sm:$0xff]  ;;  %v403_v8 = vld [vmem:[%s1748_s30 + $0x110] sm:$0xff] }
  0x22   : > { %460 = vmatpush.msra.mxu0 %v437_v11  ;;  %1581 = vmatpush.msra.mxu1 %v437_v11  ;;  %v415_v9 = vld [vmem:[%s1748_s30 + $0x170] sm:$0xff]  ;;  %v426_v10 = vld [vmem:[%s1748_s30 + $0x1c8] sm:$0xff] }
  0x23   : > { %1582 = vmatpush.msra.mxu2 %v437_v11  ;;  %1583 = vmatpush.msra.mxu3 %v437_v11 }
  0x24   : > { %461 = vmatpush.msra.mxu0 %v436_v12  ;;  %1584 = vmatpush.msra.mxu1 %v436_v12 }
  0x25   : > { %1585 = vmatpush.msra.mxu2 %v436_v12  ;;  %1586 = vmatpush.msra.mxu3 %v436_v12  ;;  %v416_v12 = vld [vmem:[%s1748_s30 + $0x178] sm:$0xff] }
  0x26   : > { %462 = vmatpush.msra.mxu0 %v435_v13  ;;  %1587 = vmatpush.msra.mxu1 %v435_v13 }
  0x27   : > { %1588 = vmatpush.msra.mxu2 %v435_v13  ;;  %1589 = vmatpush.msra.mxu3 %v435_v13  ;;  %v427_v13 = vld [vmem:[%s1748_s30 + $0x1d0] sm:$0xff] }
  0x28   : > { %463 = vmatpush.msra.mxu0 %v434_v14  ;;  %1590 = vmatpush.msra.mxu1 %v434_v14 }
  0x29   : > { %1591 = vmatpush.msra.mxu2 %v434_v14  ;;  %1592 = vmatpush.msra.mxu3 %v434_v14 }
  0x2a   : > { %464 = vmatpush.msra.mxu0 %v433_v15  ;;  %1593 = vmatpush.msra.mxu1 %v433_v15 }
  0x2b   : > { %465 = vmatmul.f32.vlgmr.msra.gmra.mxu0 %v369_v16  ;;  %1594 = vmatpush.msra.mxu2 %v433_v15  ;;  %v417_v16 = vld [vmem:[%s1748_s30 + $0x180] sm:$0xff] }
  0x2c   : > { %1595 = vmatpush.msra.mxu3 %v433_v15  ;;  %525 = vmatmul.f32.vlgmr.msra.gmra.mxu1 %v389_v21  ;;  %v429_v21 = vld [vmem:[%s1748_s30 + $0x1e0] sm:$0xff] }
  0x2d   : > { %570 = vmatmul.f32.vlgmr.msra.gmra.mxu2 %v404_v28  ;;  %615 = vmatmul.f32.vlgmr.msra.gmra.mxu3 %v419_v42 }
  0x33   : > { %468 = vmatmul.f32.gmra.mxu0 %v370_v17  ;;  %v428_v17 = vld [vmem:[%s1748_s30 + $0x1d8] sm:$0xff] }
  0x34   : > { %528 = vmatmul.f32.gmra.mxu1 %v390_v23  ;;  %v430_v23 = vld [vmem:[%s1748_s30 + $0x1e8] sm:$0xff] }
  0x35   : > { %573 = vmatmul.f32.gmra.mxu2 %v405_v31  ;;  %618 = vmatmul.f32.gmra.mxu3 %v420_v46 }
  0x3b   : > { %471 = vmatmul.f32.gmra.mxu0 %v371_v18 }
  0x3c   : > { %531 = vmatmul.f32.gmra.mxu1 %v391_v25 }
  0x3d   : > { %576 = vmatmul.f32.gmra.mxu2 %v406_v34  ;;  %621 = vmatmul.f32.gmra.mxu3 %v421_v50 }
  0x43   : > { %474 = vmatmul.f32.gmra.mxu0 %v372_v19  ;;  %v418_v19 = vld [vmem:[%s1748_s30 + $0x188] sm:$0xff] }
  0x44   : > { %534 = vmatmul.f32.gmra.mxu1 %v392_v27 }
  0x45   : > { %579 = vmatmul.f32.gmra.mxu2 %v407_v37  ;;  %624 = vmatmul.f32.gmra.mxu3 %v422_v54 }
  0x4b   : > { %477 = vmatmul.f32.gmra.mxu0 %v373_v20 }
  0x4c   : > { %537 = vmatmul.f32.gmra.mxu1 %v393_v30  ;;  %v432_v30 = vld [vmem:[%s1748_s30 + $0x1f8] sm:$0xff] }
  0x4d   : > { %582 = vmatmul.f32.gmra.mxu2 %v408_v41  ;;  %627 = vmatmul.f32.gmra.mxu3 %v423_v59 }
  0x53   : > { %480 = vmatmul.f32.gmra.mxu0 %v374_v22 }
  0x54   : > { %540 = vmatmul.f32.gmra.mxu1 %v394_v33 }
  0x55   : > { %585 = vmatmul.f32.gmra.mxu2 %v409_v45  ;;  %630 = vmatmul.f32.gmra.mxu3 %v424_v0 }
  0x5b   : > { %483 = vmatmul.f32.gmra.mxu0 %v375_v24 }
  0x5c   : > { %543 = vmatmul.f32.gmra.mxu1 %v395_v36 }
  0x5d   : > { %588 = vmatmul.f32.gmra.mxu2 %v410_v49  ;;  %633 = vmatmul.f32.gmra.mxu3 %v425_v5 }
  0x63   : > { %486 = vmatmul.f32.gmra.mxu0 %v376_v26  ;;  %v431_v26 = vld [vmem:[%s1748_s30 + $0x1f0] sm:$0xff] }
  0x64   : > { %546 = vmatmul.f32.gmra.mxu1 %v396_v40 }
  0x65   : > { %591 = vmatmul.f32.gmra.mxu2 %v411_v53  ;;  %636 = vmatmul.f32.gmra.mxu3 %v426_v10 }
  0x6b   : > { %489 = vmatmul.f32.gmra.mxu0 %v377_v29 }
  0x6c   : > { %549 = vmatmul.f32.gmra.mxu1 %v397_v44 }
  0x6d   : > { %594 = vmatmul.f32.gmra.mxu2 %v412_v58  ;;  %639 = vmatmul.f32.gmra.mxu3 %v427_v13 }
  0x73   : > { %492 = vmatmul.f32.gmra.mxu0 %v378_v32 }
  0x74   : > { %552 = vmatmul.f32.gmra.mxu1 %v398_v48 }
  0x75   : > { %597 = vmatmul.f32.gmra.mxu2 %v413_v63  ;;  %642 = vmatmul.f32.gmra.mxu3 %v428_v17 }
  0x7b   : > { %495 = vmatmul.f32.gmra.mxu0 %v379_v35 }
  0x7c   : > { %555 = vmatmul.f32.gmra.mxu1 %v399_v52 }
  0x7d   : > { %600 = vmatmul.f32.gmra.mxu2 %v414_v4  ;;  %645 = vmatmul.f32.gmra.mxu3 %v429_v21 }
  0x83   : > { %498 = vmatmul.f32.gmra.mxu0 %v380_v38 }
  0x84   : > { %558 = vmatmul.f32.gmra.mxu1 %v400_v57 }
  0x85   : > { %603 = vmatmul.f32.gmra.mxu2 %v415_v9  ;;  %648 = vmatmul.f32.gmra.mxu3 %v430_v23 }
  0x8b   : > { %501 = vmatmul.f32.gmra.mxu0 %v381_v39 }
  0x8c   : > { %561 = vmatmul.f32.gmra.mxu1 %v401_v62 }
  0x8d   : > { %606 = vmatmul.f32.gmra.mxu2 %v416_v12  ;;  %651 = vmatmul.f32.gmra.mxu3 %v431_v26 }
  0x93   : > { %504 = vmatmul.f32.gmra.mxu0 %v382_v43 }
  0x94   : > { %564 = vmatmul.f32.gmra.mxu1 %v402_v3 }
  0x95   : > { %609 = vmatmul.f32.gmra.mxu2 %v417_v16  ;;  %654 = vmatmul.f32.gmra.mxu3 %v432_v30 }
  0x9b   : > { %507 = vmatmul.f32.gmra.mxu0 %v383_v47 }
  0x9c   : > { %567 = vmatmul.f32.gmra.mxu1 %v403_v8 }
  0x9d   : > { %612 = vmatmul.f32.gmra.mxu2 %v418_v19 }
  0xa3   : > { %510 = vmatmul.f32.gmra.mxu0 %v384_v51 }
  0xa8   : > { %v1792_v55 = vpop.f32.mrf.mxu0 }
  0xa9   : > { %v1820_v14 = vpop.f32.mrf.mxu1 }
  0xab   : > { %513 = vmatmul.f32.gmra.mxu0 %v385_v56 }
  0xb0   : > { %v1798_v60 = vpop.f32.mrf.mxu0  ;;  %v1842_v28 = vpop.f32.mrf.mxu2 }
  0xb1   : > { %v1829_v20 = vpop.f32.mrf.mxu1  ;;  %v1867_v41 = vpop.f32.mrf.mxu3  ;;  %v658_v45 = vadd.f32 %v1798_v60, %v1792_v55 }
  0xb3   : > { %516 = vmatmul.f32.gmra.mxu0 %v386_v61 }
  0xb8   : > { %v1804_v1 = vpop.f32.mrf.mxu0  ;;  %v1851_v33 = vpop.f32.mrf.mxu2 }
  0xb9   : > { %v1835_v24 = vpop.f32.mrf.mxu1  ;;  %v1877_v46 = vpop.f32.mrf.mxu3  ;;  %v659_v47 = vadd.f32 %v658_v45, %v1804_v1 }
  0xba   : > { %2972 = vst [vmem:[#allocation4_spill] sm:$0xff] %v1877_v46 }
  0xbb   : > { %519 = vmatmul.f32.gmra.mxu0 %v387_v2 }
  0xc0   : > { %v1810_v6 = vpop.f32.mrf.mxu0  ;;  %v1857_v36 = vpop.f32.mrf.mxu2 }
  0xc1   : > { %v1840_v27 = vpop.f32.mrf.mxu1  ;;  %2970 = vst [vmem:[#allocation2_spill] sm:$0xff] %v1857_v36  ;;  %v660_v51 = vadd.f32 %v659_v47, %v1810_v6  ;;  %v1892_v57 = vpop.f32.mrf.mxu3 }
  0xc3   : > { %522 = vmatmul.f32.gmra.mxu0 %v388_v7 }
  0xc8   : > { %v1816_v11 = vpop.f32.mrf.mxu0  ;;  %v1863_v39 = vpop.f32.mrf.mxu2 }
  0xc9   : > { %v1847_v31 = vpop.f32.mrf.mxu1  ;;  %2971 = vst [vmem:[#allocation3_spill] sm:$0xff] %v1863_v39  ;;  %v661_v52 = vadd.f32 %v660_v51, %v1816_v11  ;;  %v1905_v4 = vpop.f32.mrf.mxu3 }
  0xca   : > { %2973 = vst [vmem:[#allocation5_spill] sm:$0xff] %v1905_v4 }
  0xd0   : > { %v1822_v15 = vpop.f32.mrf.mxu0  ;;  %v1871_v43 = vpop.f32.mrf.mxu2 }
  0xd1   : > { %v1855_v35 = vpop.f32.mrf.mxu1  ;;  %v662_v53 = vadd.f32 %v661_v52, %v1822_v15  ;;  %v1918_v17 = vpop.f32.mrf.mxu3 }
  0xd8   : > { %v1826_v18 = vpop.f32.mrf.mxu0  ;;  %v1884_v50 = vpop.f32.mrf.mxu2 }
  0xd9   : > { %v1861_v38 = vpop.f32.mrf.mxu1  ;;  %v663_v54 = vadd.f32 %v662_v53, %v1826_v18  ;;  %v1931_v52 = vpop.f32.mrf.mxu3 }
  0xda   : > { %2977 = vst [vmem:[#allocation9_spill] sm:$0xff] %v1931_v52 }
  0xe0   : > { %v1832_v22 = vpop.f32.mrf.mxu0  ;;  %v1897_v61 = vpop.f32.mrf.mxu2 }
  0xe1   : > { %v1869_v42 = vpop.f32.mrf.mxu1  ;;  %v664_v58 = vadd.f32 %v663_v54, %v1832_v22 }
  0xe8   : > { %v1837_v25 = vpop.f32.mrf.mxu0  ;;  %v1910_v8 = vpop.f32.mrf.mxu2 }
  0xe9   : > { %v1880_v48 = vpop.f32.mrf.mxu1  ;;  %v665_v62 = vadd.f32 %v664_v58, %v1837_v25  ;;  %2974 = vst [vmem:[#allocation6_spill] sm:$0xff] %v1910_v8 }
  0xf0   : > { %v1844_v29 = vpop.f32.mrf.mxu0  ;;  %v1923_v23 = vpop.f32.mrf.mxu2 }
  0xf1   : > { %v1895_v59 = vpop.f32.mrf.mxu1  ;;  %v666_v63 = vadd.f32 %v665_v62, %v1844_v29  ;;  %2976 = vst [vmem:[#allocation8_spill] sm:$0xff] %v1923_v23 }
  0xf8   : > { %v1849_v32 = vpop.f32.mrf.mxu0  ;;  %v1936_v58 = vpop.f32.mrf.mxu2 }
  0xf9   : > { %v667_v0 = vadd.f32 %v666_v63, %v1849_v32  ;;  %v1908_v7 = vpop.f32.mrf.mxu1 }
 0x100   : > { %v1853_v34 = vpop.f32.mrf.mxu0 }
 0x101   : > { %v668_v3 = vadd.f32 %v667_v0, %v1853_v34  ;;  %v1921_v21 = vpop.f32.mrf.mxu1 }
 0x102   : > { %2975 = vst [vmem:[#allocation7_spill] sm:$0xff] %v1921_v21 }
 0x108   : > { %v1859_v37 = vpop.f32.mrf.mxu0 }
 0x109   : > { %v669_v5 = vadd.f32 %v668_v3, %v1859_v37  ;;  %v1934_v54 = vpop.f32.mrf.mxu1 }
 0x10a   : > { %2978 = vst [vmem:[#allocation10_spill] sm:$0xff] %v1934_v54 }
 0x110   : > { %v1865_v40 = vpop.f32.mrf.mxu0 }
 0x111   : > { %v670_v9 = vadd.f32 %v669_v5, %v1865_v40  ;;  %v1942_v5 = vpop.f32.mrf.mxu3 }
 0x112   : > { %2979 = vst [vmem:[#allocation11_spill] sm:$0xff] %v1942_v5 }
 0x118   : > { %v1873_v44 = vpop.f32.mrf.mxu0 }
 0x119   : > { %v671_v10 = vadd.f32 %v670_v9, %v1873_v44 }
 0x120   : > { %v1882_v49 = vpop.f32.mrf.mxu0 }
 0x121   : > { %v672_v13 = vadd.f32 %v671_v10, %v1882_v49  ;;  %v1945_v10 = vpop.f32.mrf.mxu1 }
 0x122   : > { %2980 = vst [vmem:[#allocation12_spill] sm:$0xff] %v1945_v10 }
 0x128   : > { %v1890_v56 = vpop.f32.mrf.mxu0 }
 0x129   : > { %v673_v16 = vadd.f32 %v672_v13, %v1890_v56  ;;  %v1947_v13 = vpop.f32.mrf.mxu2 }
 0x130   : > { %v1902_v2 = vpop.f32.mrf.mxu0 }
 0x131   : > { %v674_v19 = vadd.f32 %v673_v16, %v1902_v2 }
 0x138   : > { %v1914_v12 = vpop.f32.mrf.mxu0 }
 0x139   : > { %v675_v26 = vadd.f32 %v674_v19, %v1914_v12 }
 0x140   : > { %v1926_v30 = vpop.f32.mrf.mxu0 }
 0x141   : > { %v676_v45 = vadd.f32 %v675_v26, %v1926_v30 }
 0x143   : > { %v677_v47 = vadd.f32 %v676_v45, %v1820_v14 }
 0x145   : > { %v678_v51 = vadd.f32 %v677_v47, %v1829_v20  ;;  %v1953_v47 = vpop.f32.mrf.mxu3 }
 0x146   : > { %2981 = vst [vmem:[#allocation13_spill] sm:$0xff] %v1953_v47 }
 0x147   : > { %v679_v53 = vadd.f32 %v678_v51, %v1835_v24 }
 0x149   : > { %v680_v62 = vadd.f32 %v679_v53, %v1840_v27  ;;  %v1956_v53 = vpop.f32.mrf.mxu1 }
 0x14b   : > { %v681_v63 = vadd.f32 %v680_v62, %v1847_v31  ;;  %v1958_v62 = vpop.f32.mrf.mxu2 }
 0x14c   : > { %2982 = vst [vmem:[#allocation14_spill] sm:$0xff] %v1958_v62 }
 0x14d   : > { %v682_v0 = vadd.f32 %v681_v63, %v1855_v35 }
 0x14f   : > { %v683_v3 = vadd.f32 %v682_v0, %v1861_v38 }
 0x151   : > { %v684_v9 = vadd.f32 %v683_v3, %v1869_v42 }
 0x153   : > { %v685_v16 = vadd.f32 %v684_v9, %v1880_v48 }
 0x155   : > { %v686_v19 = vadd.f32 %v685_v16, %v1895_v59  ;;  %v1964_v16 = vpop.f32.mrf.mxu3 }
 0x156   : > { %2983 = vst [vmem:[#allocation15_spill] sm:$0xff] %v1964_v16 }
 0x157   : > { %v687_v26 = vadd.f32 %v686_v19, %v1908_v7 }
 0x159   : > { %v688_v45 = vadd.f32 %v687_v26, %v1921_v21  ;;  %v1967_v26 = vpop.f32.mrf.mxu2 }
 0x15a   : > { %2984 = vst [vmem:[#allocation16_spill] sm:$0xff] %v1967_v26 }
 0x15b   : > { %v689_v51 = vadd.f32 %v688_v45, %v1934_v54 }
 0x15d   : > { %v690_v63 = vadd.f32 %v689_v51, %v1945_v10  ;;  %v1973_v10 = vpop.f32.mrf.mxu3 }
 0x15e   : > { %2985 = vst [vmem:[#allocation17_spill] sm:$0xff] %v1973_v10 }
 0x15f   : > { %v691_v0 = vadd.f32 %v690_v63, %v1956_v53 }
 0x161   : > { %v692_v3 = vadd.f32 %v691_v0, %v1842_v28  ;;  %v1976_v0 = vpop.f32.mrf.mxu2 }
 0x163   : > { %v693_v9 = vadd.f32 %v692_v3, %v1851_v33 }
 0x165   : > { %v694_v19 = vadd.f32 %v693_v9, %v1857_v36 }
 0x167   : > { %v695_v45 = vadd.f32 %v694_v19, %v1863_v39  ;;  %v1982_v39 = vpop.f32.mrf.mxu3 }
 0x169   : > { %v696_v54 = vadd.f32 %v695_v45, %v1871_v43  ;;  %v1985_v45 = vpop.f32.mrf.mxu2 }
 0x16b   : > { %v697_v21 = vadd.f32 %v696_v54, %v1884_v50 }
 0x16d   : > { %v698_v51 = vadd.f32 %v697_v21, %v1897_v61 }
 0x16f   : > { %v699_v63 = vadd.f32 %v698_v51, %v1910_v8 }
 0x171   : > { %v700_v3 = vadd.f32 %v699_v63, %v1923_v23  ;;  %v1991_v23 = vpop.f32.mrf.mxu3 }
 0x173   : > { %v701_v9 = vadd.f32 %v700_v3, %v1936_v58 }
 0x175   : > { %v702_v36 = vadd.f32 %v701_v9, %v1947_v13 }
 0x177   : > { %v703_v19 = vadd.f32 %v702_v36, %v1958_v62 }
 0x179   : > { %v704_v54 = vadd.f32 %v703_v19, %v1967_v26  ;;  %v652_v62 = vpop.f32.mrf.mxu3 }
 0x17b   : > { %v705_v21 = vadd.f32 %v704_v54, %v1976_v0 }
 0x17d   : > { %v706_v51 = vadd.f32 %v705_v21, %v1985_v45 }
 0x17f   : > { %v707_v8 = vadd.f32 %v706_v51, %v1867_v41 }
 0x181   : > { %v708_v63 = vadd.f32 %v707_v8, %v1877_v46 }
 0x183   : > { %v709_v3 = vadd.f32 %v708_v63, %v1892_v57  ;;  %v2003_v63 = vpop.f32.mrf.mxu3 }
 0x185   : > { %v710_v36 = vadd.f32 %v709_v3, %v1905_v4  ;;  %v1628_v4 = vmov 512.0  }
 0x186   : > { %1610 = vrcp.f32 %v1628_v4 }
 0x187   : > { %v711_v9 = vadd.f32 %v710_v36, %v1918_v17 }
 0x189   : > { %v712_v19 = vadd.f32 %v711_v9, %v1931_v52 }
 0x18b   : > { %v713_v26 = vadd.f32 %v712_v19, %v1942_v5 }
 0x18c   : > { %v1611_v19 = vpop.eup %1610 }
 0x18d   : > { %v714_v54 = vadd.f32 %v713_v26, %v1953_v47  ;;  %v728_v52 = vmul.f32 512.0, %v1611_v19  ;;  %vm732_vm0 = vweird.f32 %v1611_v19 }
 0x18f   : > { %v715_v21 = vadd.f32 %v714_v54, %v1964_v16  ;;  %v729_v47 = vsub.f32 1.0, %v728_v52 }
 0x191   : > { %v716_v51 = vadd.f32 %v715_v21, %v1973_v10  ;;  %v730_v16 = vmul.f32 %v1611_v19, %v729_v47 }
 0x193   : > { %v717_v8 = vadd.f32 %v716_v51, %v1982_v39  ;;  %v731_v10 = vadd.f32 %v1611_v19, %v730_v16 }
 0x195   : > { %v718_v46 = vadd.f32 %v717_v8, %v1991_v23  ;;  %v2006_v8 = vsel %vm732_vm0, %v1611_v19, %v731_v10 }
 0x197   : > { %v719_v3 = vadd.f32 %v718_v46, %v652_v62 }
 0x199   : > { %v720_v36 = vadd.f32 %v719_v3, %v2003_v63 }
 0x19b   : > { %v721_v9 = vrot.slane %v720_v36, 4 }
 0x19d   : > { %v722_v5 = vadd.f32 %v721_v9, %v720_v36 }
 0x19f   : > { %v723_v26 = vrot.slane %v722_v5, 2 }
 0x1a1   : > { %v724_v54 = vadd.f32 %v723_v26, %v722_v5 }
 0x1a3   : > { %v725_v21 = vrot.slane %v724_v54, 1 }
 0x1a5   : > { %v726_v51 = vadd.f32 %v725_v21, %v724_v54 }
 0x1a7   : > { %v2009_v46 = vmul.f32 %v2006_v8, %v726_v51 }
 0x1a9   : > { %v2012_v4 = vsub.f32 %v652_v62, %v2009_v46  ;;  %v2016_v3 = vsub.f32 %v1792_v55, %v2009_v46  ;;  %v2020_v52 = vsub.f32 %v1798_v60, %v2009_v46  ;;  %v2024_v5 = vsub.f32 %v1804_v1, %v2009_v46 }
 0x1aa   : > { %v2032_v62 = vsub.f32 %v1810_v6, %v2009_v46  ;;  %v2036_v55 = vsub.f32 %v1816_v11, %v2009_v46  ;;  %v2042_v1 = vsub.f32 %v1822_v15, %v2009_v46  ;;  %v2048_v6 = vsub.f32 %v1826_v18, %v2009_v46 }
 0x1ab   : > { %v799_v10 = vmul.f32 %v2016_v3, %v2016_v3  ;;  %v800_v47 = vmul.f32 %v2020_v52, %v2020_v52  ;;  %v801_v60 = vmul.f32 %v2024_v5, %v2024_v5  ;;  %v2054_v26 = vsub.f32 %v1832_v22, %v2009_v46 }
 0x1ac   : > { %v802_v36 = vmul.f32 %v2032_v62, %v2032_v62  ;;  %v803_v11 = vmul.f32 %v2036_v55, %v2036_v55  ;;  %v804_v15 = vmul.f32 %v2042_v1, %v2042_v1  ;;  %v2060_v21 = vsub.f32 %v1837_v25, %v2009_v46 }
 0x1ad   : > { %v863_v16 = vadd.f32 %v800_v47, %v799_v10  ;;  %v805_v18 = vmul.f32 %v2048_v6, %v2048_v6  ;;  %v2066_v10 = vsub.f32 %v1844_v29, %v2009_v46  ;;  %v806_v22 = vmul.f32 %v2054_v26, %v2054_v26 }
 0x1ae   : > { %v807_v25 = vmul.f32 %v2060_v21, %v2060_v21 }
 0x1af   : > { %v864_v9 = vadd.f32 %v863_v16, %v801_v60  ;;  %v2072_v60 = vsub.f32 %v1849_v32, %v2009_v46  ;;  %v808_v29 = vmul.f32 %v2066_v10, %v2066_v10 }
 0x1b1   : > { %v865_v19 = vadd.f32 %v864_v9, %v802_v36  ;;  %v2078_v36 = vsub.f32 %v1853_v34, %v2009_v46  ;;  %v809_v32 = vmul.f32 %v2072_v60, %v2072_v60 }
 0x1b3   : > { %v866_v54 = vadd.f32 %v865_v19, %v803_v11  ;;  %v2084_v11 = vsub.f32 %v1859_v37, %v2009_v46  ;;  %v810_v34 = vmul.f32 %v2078_v36, %v2078_v36 }
 0x1b5   : > { %v867_v51 = vadd.f32 %v866_v54, %v804_v15  ;;  %v2090_v15 = vsub.f32 %v1865_v40, %v2009_v46  ;;  %v811_v37 = vmul.f32 %v2084_v11, %v2084_v11 }
 0x1b7   : > { %v868_v47 = vadd.f32 %v867_v51, %v805_v18  ;;  %v2096_v18 = vsub.f32 %v1873_v44, %v2009_v46  ;;  %v812_v40 = vmul.f32 %v2090_v15, %v2090_v15 }
 0x1b9   : > { %v869_v16 = vadd.f32 %v868_v47, %v806_v22  ;;  %v2102_v22 = vsub.f32 %v1882_v49, %v2009_v46  ;;  %v813_v44 = vmul.f32 %v2096_v18, %v2096_v18 }
 0x1bb   : > { %v870_v9 = vadd.f32 %v869_v16, %v807_v25  ;;  %v2108_v25 = vsub.f32 %v1890_v56, %v2009_v46  ;;  %v814_v49 = vmul.f32 %v2102_v22, %v2102_v22 }
 0x1bd   : > { %v871_v19 = vadd.f32 %v870_v9, %v808_v29  ;;  %v2114_v29 = vsub.f32 %v1902_v2, %v2009_v46  ;;  %v815_v56 = vmul.f32 %v2108_v25, %v2108_v25 }
 0x1bf   : > { %v872_v54 = vadd.f32 %v871_v19, %v809_v32  ;;  %v2120_v32 = vsub.f32 %v1914_v12, %v2009_v46  ;;  %v816_v2 = vmul.f32 %v2114_v29, %v2114_v29 }
 0x1c1   : > { %v873_v51 = vadd.f32 %v872_v54, %v810_v34  ;;  %v2126_v34 = vsub.f32 %v1926_v30, %v2009_v46  ;;  %v817_v12 = vmul.f32 %v2120_v32, %v2120_v32 }
 0x1c3   : > { %v874_v47 = vadd.f32 %v873_v51, %v811_v37  ;;  %v2132_v37 = vsub.f32 %v1820_v14, %v2009_v46  ;;  %v818_v30 = vmul.f32 %v2126_v34, %v2126_v34 }
 0x1c5   : > { %v875_v16 = vadd.f32 %v874_v47, %v812_v40  ;;  %v2138_v40 = vsub.f32 %v1829_v20, %v2009_v46  ;;  %v819_v14 = vmul.f32 %v2132_v37, %v2132_v37 }
 0x1c7   : > { %v876_v9 = vadd.f32 %v875_v16, %v813_v44  ;;  %v2144_v44 = vsub.f32 %v1835_v24, %v2009_v46  ;;  %v820_v20 = vmul.f32 %v2138_v40, %v2138_v40 }
 0x1c9   : > { %v877_v19 = vadd.f32 %v876_v9, %v814_v49  ;;  %v2150_v49 = vsub.f32 %v1840_v27, %v2009_v46  ;;  %v821_v24 = vmul.f32 %v2144_v44, %v2144_v44 }
 0x1cb   : > { %v878_v54 = vadd.f32 %v877_v19, %v815_v56  ;;  %v2156_v56 = vsub.f32 %v1847_v31, %v2009_v46  ;;  %v822_v27 = vmul.f32 %v2150_v49, %v2150_v49 }
 0x1cd   : > { %v879_v51 = vadd.f32 %v878_v54, %v816_v2  ;;  %v2162_v2 = vsub.f32 %v1855_v35, %v2009_v46  ;;  %v823_v31 = vmul.f32 %v2156_v56, %v2156_v56 }
 0x1cf   : > { %v880_v47 = vadd.f32 %v879_v51, %v817_v12  ;;  %v2168_v12 = vsub.f32 %v1861_v38, %v2009_v46  ;;  %v824_v35 = vmul.f32 %v2162_v2, %v2162_v2 }
 0x1d1   : > { %v881_v16 = vadd.f32 %v880_v47, %v818_v30  ;;  %v2174_v30 = vsub.f32 %v1869_v42, %v2009_v46  ;;  %v825_v38 = vmul.f32 %v2168_v12, %v2168_v12 }
 0x1d3   : > { %v882_v9 = vadd.f32 %v881_v16, %v819_v14  ;;  %v2180_v14 = vsub.f32 %v1880_v48, %v2009_v46  ;;  %v826_v42 = vmul.f32 %v2174_v30, %v2174_v30 }
 0x1d5   : > { %v883_v19 = vadd.f32 %v882_v9, %v820_v20  ;;  %v2186_v20 = vsub.f32 %v1895_v59, %v2009_v46  ;;  %v827_v48 = vmul.f32 %v2180_v14, %v2180_v14 }
 0x1d7   : > { %v884_v54 = vadd.f32 %v883_v19, %v821_v24  ;;  %v2192_v24 = vsub.f32 %v1908_v7, %v2009_v46  ;;  %v828_v59 = vmul.f32 %v2186_v20, %v2186_v20 }
 0x1d9   : > { %v885_v51 = vadd.f32 %v884_v54, %v822_v27  ;;  %v2986_v27 = vld [vmem:[#allocation7_spill] sm:$0xff]  ;;  %v829_v7 = vmul.f32 %v2192_v24, %v2192_v24 }
 0x1da   : > { %v2198_v54 = vsub.f32 %v2986_v27, %v2009_v46  ;;  %v2216_v27 = vsub.f32 %v1956_v53, %v2009_v46 }
 0x1db   : > { %v886_v47 = vadd.f32 %v885_v51, %v823_v31  ;;  %v2987_v51 = vld [vmem:[#allocation10_spill] sm:$0xff] }
 0x1dc   : > { %v833_v53 = vmul.f32 %v2216_v27, %v2216_v27 }
 0x1dd   : > { %v887_v16 = vadd.f32 %v886_v47, %v824_v35  ;;  %v2204_v35 = vsub.f32 %v2987_v51, %v2009_v46  ;;  %v2222_v51 = vsub.f32 %v1842_v28, %v2009_v46 }
 0x1df   : > { %v888_v9 = vadd.f32 %v887_v16, %v825_v38  ;;  %2988 = vst [vmem:[#allocation7_spill] sm:$0xff] %v2204_v35  ;;  %v2989_v38 = vld [vmem:[#allocation12_spill] sm:$0xff]  ;;  %v834_v28 = vmul.f32 %v2222_v51, %v2222_v51 }
 0x1e0   : > { %v2210_v16 = vsub.f32 %v2989_v38, %v2009_v46  ;;  %v2228_v38 = vsub.f32 %v1851_v33, %v2009_v46 }
 0x1e1   : > { %v889_v19 = vadd.f32 %v888_v9, %v826_v42  ;;  %v830_v42 = vmul.f32 %v2198_v54, %v2198_v54 }
 0x1e2   : > { %2990 = vst [vmem:[#allocation10_spill] sm:$0xff] %v2210_v16  ;;  %v835_v33 = vmul.f32 %v2228_v38, %v2228_v38 }
 0x1e3   : > { %v890_v31 = vadd.f32 %v889_v19, %v827_v48  ;;  %v831_v48 = vmul.f32 %v2204_v35, %v2204_v35 }
 0x1e5   : > { %v891_v47 = vadd.f32 %v890_v31, %v828_v59  ;;  %v832_v59 = vmul.f32 %v2210_v16, %v2210_v16 }
 0x1e7   : > { %v892_v9 = vadd.f32 %v891_v47, %v829_v7  ;;  %v2991_v47 = vld [vmem:[#allocation2_spill] sm:$0xff] }
 0x1e8   : > { %v2234_v35 = vsub.f32 %v2991_v47, %v2009_v46  ;;  %v2252_v47 = vsub.f32 %v1884_v50, %v2009_v46 }
 0x1e9   : > { %v893_v19 = vadd.f32 %v892_v9, %v830_v42  ;;  %v2993_v9 = vld [vmem:[#allocation3_spill] sm:$0xff] }
 0x1ea   : > { %2992 = vst [vmem:[#allocation12_spill] sm:$0xff] %v2234_v35  ;;  %v2240_v16 = vsub.f32 %v2993_v9, %v2009_v46  ;;  %v2258_v9 = vsub.f32 %v1897_v61, %v2009_v46  ;;  %v839_v50 = vmul.f32 %v2252_v47, %v2252_v47 }
 0x1eb   : > { %v894_v31 = vadd.f32 %v893_v19, %v831_v48  ;;  %v2246_v19 = vsub.f32 %v1871_v43, %v2009_v46 }
 0x1ec   : > { %2994 = vst [vmem:[#allocation2_spill] sm:$0xff] %v2240_v16  ;;  %v840_v61 = vmul.f32 %v2258_v9, %v2258_v9 }
 0x1ed   : > { %v895_v7 = vadd.f32 %v894_v31, %v832_v59  ;;  %v836_v59 = vmul.f32 %v2234_v35, %v2234_v35  ;;  %2995 = vst [vmem:[#allocation3_spill] sm:$0xff] %v2258_v9  ;;  %v838_v43 = vmul.f32 %v2246_v19, %v2246_v19 }
 0x1ef   : > { %v896_v42 = vadd.f32 %v895_v7, %v833_v53  ;;  %v837_v53 = vmul.f32 %v2240_v16, %v2240_v16 }
 0x1f1   : > { %v897_v48 = vadd.f32 %v896_v42, %v834_v28  ;;  %v2996_v42 = vld [vmem:[#allocation6_spill] sm:$0xff] }
 0x1f2   : > { %v2264_v35 = vsub.f32 %v2996_v42, %v2009_v46  ;;  %v2282_v42 = vsub.f32 %v1947_v13, %v2009_v46 }
 0x1f3   : > { %v898_v31 = vadd.f32 %v897_v48, %v835_v33  ;;  %v2998_v48 = vld [vmem:[#allocation8_spill] sm:$0xff] }
 0x1f4   : > { %2997 = vst [vmem:[#allocation6_spill] sm:$0xff] %v2264_v35  ;;  %v2270_v16 = vsub.f32 %v2998_v48, %v2009_v46  ;;  %v3002_v48 = vld [vmem:[#allocation14_spill] sm:$0xff]  ;;  %v844_v13 = vmul.f32 %v2282_v42, %v2282_v42 }
 0x1f5   : > { %v899_v7 = vadd.f32 %v898_v31, %v836_v59  ;;  %v2276_v31 = vsub.f32 %v1936_v58, %v2009_v46  ;;  %3001 = vst [vmem:[#allocation19_spill] sm:$0xff] %v2282_v42  ;;  %v2288_v9 = vsub.f32 %v3002_v48, %v2009_v46  ;;  %v2306_v48 = vsub.f32 %v1985_v45, %v2009_v46 }
 0x1f6   : > { %2999 = vst [vmem:[#allocation8_spill] sm:$0xff] %v2270_v16 }
 0x1f7   : > { %v900_v28 = vadd.f32 %v899_v7, %v837_v53  ;;  %3000 = vst [vmem:[#allocation18_spill] sm:$0xff] %v2276_v31  ;;  %v841_v53 = vmul.f32 %v2264_v35, %v2264_v35  ;;  %v843_v58 = vmul.f32 %v2276_v31, %v2276_v31  ;;  %v848_v45 = vmul.f32 %v2306_v48, %v2306_v48 }
 0x1f9   : > { %v901_v33 = vadd.f32 %v900_v28, %v838_v43  ;;  %v842_v43 = vmul.f32 %v2270_v16, %v2270_v16 }
 0x1fb   : > { %v902_v59 = vadd.f32 %v901_v33, %v839_v50  ;;  %v3003_v33 = vld [vmem:[#allocation16_spill] sm:$0xff] }
 0x1fc   : > { %v2294_v35 = vsub.f32 %v3003_v33, %v2009_v46  ;;  %v2312_v33 = vsub.f32 %v1867_v41, %v2009_v46 }
 0x1fd   : > { %v903_v7 = vadd.f32 %v902_v59, %v840_v61  ;;  %v2300_v59 = vsub.f32 %v1976_v0, %v2009_v46 }
 0x1fe   : > { %3004 = vst [vmem:[#allocation14_spill] sm:$0xff] %v2312_v33  ;;  %v849_v41 = vmul.f32 %v2312_v33, %v2312_v33 }
 0x1ff   : > { %v904_v28 = vadd.f32 %v903_v7, %v841_v53  ;;  %v845_v53 = vmul.f32 %v2288_v9, %v2288_v9  ;;  %v847_v0 = vmul.f32 %v2300_v59, %v2300_v59 }
 0x201   : > { %v905_v50 = vadd.f32 %v904_v28, %v842_v43  ;;  %v846_v43 = vmul.f32 %v2294_v35, %v2294_v35 }
 0x203   : > { %v906_v61 = vadd.f32 %v905_v50, %v843_v58  ;;  %v3005_v50 = vld [vmem:[#allocation4_spill] sm:$0xff] }
 0x204   : > { %v2318_v42 = vsub.f32 %v3005_v50, %v2009_v46  ;;  %v2336_v50 = vsub.f32 %v1918_v17, %v2009_v46 }
 0x205   : > { %v907_v7 = vadd.f32 %v906_v61, %v844_v13  ;;  %v2324_v61 = vsub.f32 %v1892_v57, %v2009_v46 }
 0x206   : > { %3006 = vst [vmem:[#allocation16_spill] sm:$0xff] %v2318_v42  ;;  %v853_v17 = vmul.f32 %v2336_v50, %v2336_v50 }
 0x207   : > { %v908_v28 = vadd.f32 %v907_v7, %v845_v53  ;;  %3007 = vst [vmem:[#allocation4_spill] sm:$0xff] %v2324_v61  ;;  %v3008_v7 = vld [vmem:[#allocation5_spill] sm:$0xff]  ;;  %v851_v57 = vmul.f32 %v2324_v61, %v2324_v61 }
 0x208   : > { %v2330_v31 = vsub.f32 %v3008_v7, %v2009_v46  ;;  %3010 = vst [vmem:[#allocation20_spill] sm:$0xff] %v2336_v50  ;;  %v3013_v7 = vld [vmem:[#allocation11_spill] sm:$0xff] }
 0x209   : > { %v909_v58 = vadd.f32 %v908_v28, %v846_v43  ;;  %v850_v43 = vmul.f32 %v2318_v42, %v2318_v42  ;;  %v2348_v42 = vsub.f32 %v3013_v7, %v2009_v46  ;;  %v3019_v7 = vld [vmem:[#allocation17_spill] sm:$0xff] }
 0x20a   : > { %3009 = vst [vmem:[#allocation5_spill] sm:$0xff] %v2330_v31  ;;  %v2366_v50 = vsub.f32 %v3019_v7, %v2009_v46 }
 0x20b   : > { %v910_v13 = vadd.f32 %v909_v58, %v847_v0  ;;  %v3011_v58 = vld [vmem:[#allocation9_spill] sm:$0xff]  ;;  %3014 = vst [vmem:[#allocation11_spill] sm:$0xff] %v2348_v42 }
 0x20c   : > { %v2342_v33 = vsub.f32 %v3011_v58, %v2009_v46  ;;  %v3017_v58 = vld [vmem:[#allocation15_spill] sm:$0xff]  ;;  %3020 = vst [vmem:[#allocation17_spill] sm:$0xff] %v2366_v50 }
 0x20d   : > { %v911_v53 = vadd.f32 %v910_v13, %v848_v45  ;;  %v852_v45 = vmul.f32 %v2330_v31, %v2330_v31  ;;  %v2360_v31 = vsub.f32 %v3017_v58, %v2009_v46  ;;  %v2378_v58 = vsub.f32 %v1991_v23, %v2009_v46 }
 0x20e   : > { %3012 = vst [vmem:[#allocation9_spill] sm:$0xff] %v2342_v33 }
 0x20f   : > { %v912_v28 = vadd.f32 %v911_v53, %v849_v41  ;;  %v3015_v53 = vld [vmem:[#allocation13_spill] sm:$0xff]  ;;  %3018 = vst [vmem:[#allocation15_spill] sm:$0xff] %v2360_v31 }
 0x210   : > { %v2354_v61 = vsub.f32 %v3015_v53, %v2009_v46  ;;  %v2372_v53 = vsub.f32 %v1982_v39, %v2009_v46  ;;  %3022 = vst [vmem:[#allocation22_spill] sm:$0xff] %v2378_v58  ;;  %v798_v39 = vsub.f32 %v2003_v63, %v2009_v46 }
 0x211   : > { %v913_v0 = vadd.f32 %v912_v28, %v850_v43  ;;  %v854_v43 = vmul.f32 %v2342_v33, %v2342_v33 }
 0x212   : > { %3016 = vst [vmem:[#allocation13_spill] sm:$0xff] %v2354_v61  ;;  %v859_v7 = vmul.f32 %v2372_v53, %v2372_v53 }
 0x213   : > { %v914_v13 = vadd.f32 %v913_v0, %v851_v57  ;;  %v855_v57 = vmul.f32 %v2348_v42, %v2348_v42  ;;  %3021 = vst [vmem:[#allocation21_spill] sm:$0xff] %v2372_v53 }
 0x215   : > { %v915_v41 = vadd.f32 %v914_v13, %v852_v45  ;;  %v856_v45 = vmul.f32 %v2354_v61, %v2354_v61 }
 0x217   : > { %v916_v28 = vadd.f32 %v915_v41, %v853_v17  ;;  %v857_v17 = vmul.f32 %v2360_v31, %v2360_v31 }
 0x219   : > { %v917_v0 = vadd.f32 %v916_v28, %v854_v43  ;;  %v858_v43 = vmul.f32 %v2366_v50, %v2366_v50 }
 0x21b   : > { %v918_v13 = vadd.f32 %v917_v0, %v855_v57  ;;  %v860_v0 = vmul.f32 %v2378_v58, %v2378_v58 }
 0x21d   : > { %v919_v41 = vadd.f32 %v918_v13, %v856_v45  ;;  %v861_v45 = vmul.f32 %v2012_v4, %v2012_v4  ;;  %v862_v13 = vmul.f32 %v798_v39, %v798_v39 }
 0x21f   : > { %v920_v28 = vadd.f32 %v919_v41, %v857_v17 }
 0x221   : > { %v921_v57 = vadd.f32 %v920_v28, %v858_v43 }
 0x223   : > { %v922_v33 = vadd.f32 %v921_v57, %v859_v7 }
 0x225   : > { %v923_v23 = vadd.f32 %v922_v33, %v860_v0 }
 0x227   : > { %v924_v42 = vadd.f32 %v923_v23, %v861_v45 }
 0x229   : > { %v925_v61 = vadd.f32 %v924_v42, %v862_v13  ;;  %v3024_v13 = vld [vmem:[#allocation7_spill] sm:$0xff] }
 0x22b   : > { %v926_v31 = vrot.slane %v925_v61, 4 }
 0x22d   : > { %v927_v17 = vadd.f32 %v926_v31, %v925_v61  ;;  %v2396_v31 = vld [vmem:[%s2924_s2] ss:$0 sm:$0xff] }
 0x22f   : > { %v928_v41 = vrot.slane %v927_v17, 2 }
 0x231   : > { %v929_v50 = vadd.f32 %v928_v41, %v927_v17 }
 0x233   : > { %v930_v53 = vrot.slane %v929_v50, 1 }
 0x235   : > { %v931_v43 = vadd.f32 %v930_v53, %v929_v50  ;;  %v2403_v50 = vld [vmem:[%s2925_s3] ss:$0 sm:$0xff] }
 0x237   : > { %v932_v28 = vmul.f32 %v931_v43, %v2006_v8 }
 0x239   : > { %v933_v63 = vadd.f32 1e-05, %v932_v28 }
 0x23b   : > { %1612 = vrsqrt.f32 %v933_v63  ;;  %vm940_vm2 = vweird.f32 %v933_v63 }
 0x241   : > { %v1613_v46 = vpop.eup %1612 }
 0x242   : > { %v935_v58 = vmul.f32 %v1613_v46, %v933_v63  ;;  %vm941_vm1 = vweird.f32 %v1613_v46  ;;  %v3028_v63 = vld [vmem:[#allocation2_spill] sm:$0xff] }
 0x243   : > { %vm942_vm3 = vmor %vm940_vm2, %vm941_vm1 }
 0x244   : > { %v936_v7 = vmul.f32 %v1613_v46, %v935_v58 }
 0x246   : > { %v937_v57 = vmul.f32 0.5, %v936_v7 }
 0x248   : > { %v938_v16 = vsub.f32 1.5, %v937_v57 }
 0x24a   : > { %v939_v33 = vmul.f32 %v1613_v46, %v938_v16 }
 0x24c   : > { %v2391_v42 = vsel %vm942_vm3, %v1613_v46, %v939_v33  ;;  %v3030_v33 = vld [vmem:[#allocation3_spill] sm:$0xff] }
 0x24d   : > { %v1007_v8 = vmul.f32 %v2391_v42, %v798_v39  ;;  %v2407_v16 = vmul.f32 %v2391_v42, %v2016_v3  ;;  %v2411_v53 = vmul.f32 %v2391_v42, %v2020_v52  ;;  %v2415_v58 = vmul.f32 %v2391_v42, %v2024_v5 }
 0x24e   : > { %v2419_v39 = vmul.f32 %v2391_v42, %v2032_v62  ;;  %v2423_v0 = vmul.f32 %v2391_v42, %v2036_v55  ;;  %v2427_v3 = vmul.f32 %v2391_v42, %v2042_v1  ;;  %v2431_v52 = vmul.f32 %v2391_v42, %v2048_v6 }
 0x24f   : > { %v1075_v61 = vmul.f32 %v2396_v31, %v1007_v8  ;;  %v2435_v5 = vmul.f32 %v2391_v42, %v2054_v26  ;;  %v2439_v62 = vmul.f32 %v2391_v42, %v2060_v21  ;;  %v2443_v55 = vmul.f32 %v2391_v42, %v2066_v10 }
 0x250   : > { %v2447_v1 = vmul.f32 %v2391_v42, %v2072_v60  ;;  %v2454_v6 = vmul.f32 %v2391_v42, %v2078_v36  ;;  %v2458_v26 = vmul.f32 %v2391_v42, %v2084_v11  ;;  %v957_v21 = vmul.f32 %v2391_v42, %v2090_v15 }
 0x251   : > { %v2450_v45 = vadd.f32 %v2403_v50, %v1075_v61  ;;  %v958_v10 = vmul.f32 %v2391_v42, %v2096_v18  ;;  %v959_v60 = vmul.f32 %v2391_v42, %v2102_v22  ;;  %v2468_v23 = vmul.f32 %v2391_v42, %v2108_v25  ;;  %v3031_v61 = vld [vmem:[#allocation6_spill] sm:$0xff] }
 0x252   : > { %v2472_v36 = vmul.f32 %v2391_v42, %v2114_v29  ;;  %v2476_v11 = vmul.f32 %v2391_v42, %v2120_v32  ;;  %v2480_v15 = vmul.f32 %v2391_v42, %v2126_v34  ;;  %v2484_v18 = vmul.f32 %v2391_v42, %v2132_v37 }
 0x253   : > { %3023 = vst [vmem:[#allocation23_spill] sm:$0xff] %v2450_v45  ;;  %v2488_v22 = vmul.f32 %v2391_v42, %v2138_v40  ;;  %v2492_v25 = vmul.f32 %v2391_v42, %v2144_v44  ;;  %v2496_v29 = vmul.f32 %v2391_v42, %v2150_v49  ;;  %v2500_v32 = vmul.f32 %v2391_v42, %v2156_v56 }
 0x254   : > { %v992_v34 = vmul.f32 %v2391_v42, %v2300_v59  ;;  %v2506_v37 = vmul.f32 %v2391_v42, %v2162_v2  ;;  %v2510_v40 = vmul.f32 %v2391_v42, %v2168_v12  ;;  %v2514_v44 = vmul.f32 %v2391_v42, %v2174_v30  ;;  %v3025_v30 = vld [vmem:[#allocation10_spill] sm:$0xff] }
 0x255   : > { %v993_v49 = vmul.f32 %v2391_v42, %v2306_v48  ;;  %v972_v56 = vmul.f32 %v2391_v42, %v2180_v14  ;;  %v973_v59 = vmul.f32 %v2391_v42, %v2186_v20  ;;  %v974_v2 = vmul.f32 %v2391_v42, %v2192_v24 }
 0x256   : > { %v975_v12 = vmul.f32 %v2391_v42, %v2198_v54  ;;  %v2528_v17 = vmul.f32 %v2391_v42, %v3024_v13  ;;  %v2532_v41 = vmul.f32 %v2391_v42, %v3025_v30  ;;  %v2536_v14 = vmul.f32 %v2391_v42, %v2216_v27  ;;  %v3026_v54 = vld [vmem:[#allocation12_spill] sm:$0xff]  ;;  %v3035_v30 = vld [vmem:[#allocation17_spill] sm:$0xff] }
 0x257   : > { %v2540_v20 = vmul.f32 %v2391_v42, %v2222_v51  ;;  %v2544_v24 = vmul.f32 %v2391_v42, %v2228_v38  ;;  %v2548_v48 = vmul.f32 %v2391_v42, %v3026_v54  ;;  %v1027_v43 = vmul.f32 %v2396_v31, %v959_v60  ;;  %v3037_v54 = vld [vmem:[#allocation21_spill] sm:$0xff] }
 0x258   : > { %v2552_v28 = vmul.f32 %v2396_v31, %v992_v34  ;;  %v2556_v27 = vmul.f32 %v2391_v42, %v3028_v63  ;;  %v990_v51 = vmul.f32 %v2391_v42, %v2288_v9  ;;  %v991_v38 = vmul.f32 %v2391_v42, %v2294_v35  ;;  %v3032_v35 = vld [vmem:[#allocation8_spill] sm:$0xff]  ;;  %v3033_v34 = vld [vmem:[#allocation18_spill] sm:$0xff] }
 0x259   : > { %v2563_v46 = vmul.f32 %v2396_v31, %v993_v49  ;;  %v2567_v7 = vmul.f32 %v2391_v42, %v2246_v19  ;;  %v2571_v57 = vmul.f32 %v2391_v42, %v2252_v47  ;;  %v2575_v8 = vmul.f32 %v2391_v42, %v3030_v33  ;;  %v3034_v19 = vld [vmem:[#allocation19_spill] sm:$0xff]  ;;  %v3039_v33 = vld [vmem:[#allocation22_spill] sm:$0xff] }
 0x25a   : > { %3027 = vst [vmem:[#allocation7_spill] sm:$0xff] %v2552_v28  ;;  %v2579_v9 = vmul.f32 %v2391_v42, %v3031_v61  ;;  %v987_v60 = vmul.f32 %v2391_v42, %v3032_v35  ;;  %v988_v49 = vmul.f32 %v2391_v42, %v3033_v34  ;;  %v989_v13 = vmul.f32 %v2391_v42, %v3034_v19 }
 0x25b   : > { %3029 = vst [vmem:[#allocation10_spill] sm:$0xff] %v2563_v46  ;;  %v2589_v47 = vmul.f32 %v2391_v42, %v3035_v30  ;;  %v2593_v63 = vmul.f32 %v2391_v42, %v3037_v54  ;;  %v1005_v61 = vmul.f32 %v2391_v42, %v3039_v33  ;;  %v1095_v28 = vadd.f32 %v2403_v50, %v1027_v43 }
 0x25c   : > { %v1043_v35 = vmul.f32 %v2396_v31, %v975_v12  ;;  %v1059_v34 = vmul.f32 %v2396_v31, %v991_v38  ;;  %v1026_v46 = vmul.f32 %v2396_v31, %v958_v10  ;;  %v1042_v19 = vmul.f32 %v2396_v31, %v974_v2 }
 0x25d   : > { %3036 = vst [vmem:[#allocation12_spill] sm:$0xff] %v2589_v47  ;;  %v1058_v30 = vmul.f32 %v2396_v31, %v990_v51  ;;  %v1159_v45 = vmax.f32 %v1095_v28, 0.0  ;;  %v1025_v54 = vmul.f32 %v2396_v31, %v957_v21  ;;  %v1057_v51 = vmul.f32 %v2396_v31, %v989_v13 }
 0x25e   : > { %3038 = vst [vmem:[#allocation2_spill] sm:$0xff] %v2593_v63  ;;  %v1111_v47 = vadd.f32 %v2403_v50, %v1043_v35  ;;  %v1041_v63 = vmul.f32 %v2396_v31, %v973_v59  ;;  %v1127_v33 = vadd.f32 %v2403_v50, %v1059_v34  ;;  %v1094_v43 = vadd.f32 %v2403_v50, %v1026_v46 }
 0x25f   : > { %v1110_v12 = vadd.f32 %v2403_v50, %v1042_v19  ;;  %v1126_v38 = vadd.f32 %v2403_v50, %v1058_v30  ;;  %1219 = vmatpush.msrb.mxu1 %v1159_v45  ;;  %v1093_v2 = vadd.f32 %v2403_v50, %v1025_v54  ;;  %v1006_v21 = vmul.f32 %v2391_v42, %v2012_v4 }
 0x260   : > { %v1175_v10 = vmax.f32 %v1111_v47, 0.0  ;;  %v1109_v28 = vadd.f32 %v2403_v50, %v1041_v63  ;;  %v2616_v59 = vmul.f32 %v2396_v31, %v1005_v61  ;;  %v1191_v35 = vmax.f32 %v1127_v33, 0.0 }
 0x261   : > { %v1158_v46 = vmax.f32 %v1094_v43, 0.0  ;;  %v1174_v34 = vmax.f32 %v1110_v12, 0.0  ;;  %v1190_v19 = vmax.f32 %v1126_v38, 0.0  ;;  %v1125_v45 = vadd.f32 %v2403_v50, %v1057_v51 }
 0x262   : > { %1239 = vmatpush.msrb.mxu2 %v1175_v10  ;;  %v1024_v47 = vmul.f32 %v2396_v31, %v2458_v26  ;;  %1259 = vmatpush.msrb.mxu3 %v1191_v35  ;;  %v1157_v63 = vmax.f32 %v1093_v2, 0.0  ;;  %v1040_v13 = vmul.f32 %v2396_v31, %v972_v56  ;;  %v1056_v4 = vmul.f32 %v2396_v31, %v988_v49 }
 0x263   : > { %1220 = vmatpush.msrb.mxu1 %v1158_v46  ;;  %v1023_v61 = vmul.f32 %v2396_v31, %v2454_v6  ;;  %v1173_v30 = vmax.f32 %v1109_v28, 0.0  ;;  %v1039_v33 = vmul.f32 %v2396_v31, %v2514_v44  ;;  %v1055_v43 = vmul.f32 %v2396_v31, %v987_v60 }
 0x264   : > { %1240 = vmatpush.msrb.mxu2 %v1174_v34  ;;  %v1092_v54 = vadd.f32 %v2403_v50, %v1024_v47  ;;  %1260 = vmatpush.msrb.mxu3 %v1190_v19  ;;  %v1189_v26 = vmax.f32 %v1125_v45, 0.0  ;;  %v1108_v12 = vadd.f32 %v2403_v50, %v1040_v13  ;;  %v1124_v56 = vadd.f32 %v2403_v50, %v1056_v4 }
 0x265   : > { %1221 = vmatpush.msrb.mxu1 %v1157_v63  ;;  %v1091_v49 = vadd.f32 %v2403_v50, %v1023_v61  ;;  %v1107_v38 = vadd.f32 %v2403_v50, %v1039_v33  ;;  %v1123_v10 = vadd.f32 %v2403_v50, %v1055_v43  ;;  %v1022_v44 = vmul.f32 %v2396_v31, %v2447_v1 }
 0x266   : > { %1241 = vmatpush.msrb.mxu2 %v1173_v30  ;;  %v1156_v6 = vmax.f32 %v1092_v54, 0.0  ;;  %v2637_v60 = vmul.f32 %v2396_v31, %v1006_v21  ;;  %1261 = vmatpush.msrb.mxu3 %v1189_v26  ;;  %v1172_v2 = vmax.f32 %v1108_v12, 0.0  ;;  %v1188_v28 = vmax.f32 %v1124_v56, 0.0 }
 0x267   : > { %v1038_v51 = vmul.f32 %v2396_v31, %v2510_v40  ;;  %v1155_v35 = vmax.f32 %v1091_v49, 0.0  ;;  %v1171_v46 = vmax.f32 %v1107_v38, 0.0  ;;  %v1090_v34 = vadd.f32 %v2403_v50, %v1022_v44 }
 0x268   : > { %1222 = vmatpush.msrb.mxu1 %v1156_v6  ;;  %v1054_v19 = vmul.f32 %v2396_v31, %v2579_v9  ;;  %1242 = vmatpush.msrb.mxu2 %v1172_v2  ;;  %v1187_v1 = vmax.f32 %v1123_v10, 0.0  ;;  %v1021_v45 = vmul.f32 %v2396_v31, %v2443_v55  ;;  %v1037_v47 = vmul.f32 %v2396_v31, %v2506_v37 }
 0x269   : > { %1262 = vmatpush.msrb.mxu3 %v1188_v28  ;;  %v1106_v21 = vadd.f32 %v2403_v50, %v1038_v51  ;;  %v1154_v40 = vmax.f32 %v1090_v34, 0.0  ;;  %v1053_v13 = vmul.f32 %v2396_v31, %v2575_v8  ;;  %v1020_v9 = vmul.f32 %v2396_v31, %v2439_v62 }
 0x26a   : > { %1223 = vmatpush.msrb.mxu1 %v1155_v35  ;;  %v1122_v63 = vadd.f32 %v2403_v50, %v1054_v19  ;;  %1243 = vmatpush.msrb.mxu2 %v1171_v46  ;;  %v1089_v61 = vadd.f32 %v2403_v50, %v1021_v45  ;;  %v1105_v55 = vadd.f32 %v2403_v50, %v1037_v47 }
 0x26b   : > { %1263 = vmatpush.msrb.mxu3 %v1187_v1  ;;  %v1170_v4 = vmax.f32 %v1106_v21, 0.0  ;;  %v1036_v37 = vmul.f32 %v2396_v31, %v2500_v32  ;;  %v1121_v54 = vadd.f32 %v2403_v50, %v1053_v13  ;;  %v1088_v33 = vadd.f32 %v2403_v50, %v1020_v9 }
 0x26c   : > { %1224 = vmatpush.msrb.mxu1 %v1154_v40  ;;  %v1186_v30 = vmax.f32 %v1122_v63, 0.0  ;;  %v1052_v8 = vmul.f32 %v2396_v31, %v2571_v57  ;;  %v1153_v62 = vmax.f32 %v1089_v61, 0.0  ;;  %v1169_v43 = vmax.f32 %v1105_v55, 0.0 }
 0x26d   : > { %1244 = vmatpush.msrb.mxu2 %v1170_v4  ;;  %v1104_v26 = vadd.f32 %v2403_v50, %v1036_v37  ;;  %v1019_v12 = vmul.f32 %v2396_v31, %v2435_v5  ;;  %v1185_v56 = vmax.f32 %v1121_v54, 0.0  ;;  %v1152_v32 = vmax.f32 %v1088_v33, 0.0 }
 0x26e   : > { %1264 = vmatpush.msrb.mxu3 %v1186_v30  ;;  %v1120_v49 = vadd.f32 %v2403_v50, %v1052_v8  ;;  %v1035_v6 = vmul.f32 %v2396_v31, %v2496_v29  ;;  %1225 = vmatpush.msrb.mxu1 %v1153_v62  ;;  %v1051_v10 = vmul.f32 %v2396_v31, %v2567_v7 }
 0x26f   : > { %1245 = vmatpush.msrb.mxu2 %v1169_v43  ;;  %v1168_v38 = vmax.f32 %v1104_v26, 0.0  ;;  %v1087_v57 = vadd.f32 %v2403_v50, %v1019_v12  ;;  %v1018_v44 = vmul.f32 %v2396_v31, %v2431_v52  ;;  %v1034_v28 = vmul.f32 %v2396_v31, %v2492_v25 }
 0x270   : > { %1265 = vmatpush.msrb.mxu3 %v1185_v56  ;;  %v1184_v5 = vmax.f32 %v1120_v49, 0.0  ;;  %v1103_v2 = vadd.f32 %v2403_v50, %v1035_v6  ;;  %v1050_v29 = vmul.f32 %v2396_v31, %v2556_v27  ;;  %1226 = vmatpush.msrb.mxu1 %v1152_v32  ;;  %v1119_v35 = vadd.f32 %v2403_v50, %v1051_v10 }
 0x271   : > { %1246 = vmatpush.msrb.mxu2 %v1168_v38  ;;  %v1151_v51 = vmax.f32 %v1087_v57, 0.0  ;;  %v1086_v7 = vadd.f32 %v2403_v50, %v1018_v44  ;;  %v1017_v52 = vmul.f32 %v2396_v31, %v2427_v3  ;;  %v1102_v34 = vadd.f32 %v2403_v50, %v1034_v28 }
 0x272   : > { %1266 = vmatpush.msrb.mxu3 %v1184_v5  ;;  %v1167_v46 = vmax.f32 %v1103_v2, 0.0  ;;  %v1118_v19 = vadd.f32 %v2403_v50, %v1050_v29  ;;  %v1033_v25 = vmul.f32 %v2396_v31, %v2488_v22  ;;  %v1183_v27 = vmax.f32 %v1119_v35, 0.0 }
 0x273   : > { %1227 = vmatpush.msrb.mxu1 %v1151_v51  ;;  %v1150_v1 = vmax.f32 %v1086_v7, 0.0  ;;  %v1085_v21 = vadd.f32 %v2403_v50, %v1017_v52  ;;  %v1049_v45 = vmul.f32 %v2396_v31, %v2548_v48  ;;  %v1166_v47 = vmax.f32 %v1102_v34, 0.0  ;;  %v3041_v34 = vld [vmem:[#allocation2_spill] sm:$0xff] }
 0x274   : > { %1247 = vmatpush.msrb.mxu2 %v1167_v46  ;;  %v1182_v3 = vmax.f32 %v1118_v19, 0.0  ;;  %v1101_v40 = vadd.f32 %v2403_v50, %v1033_v25  ;;  %v1016_v63 = vmul.f32 %v2396_v31, %v2423_v0  ;;  %1267 = vmatpush.msrb.mxu3 %v1183_v27  ;;  %v1032_v9 = vmul.f32 %v2396_v31, %v2484_v18 }
 0x275   : > { %1228 = vmatpush.msrb.mxu1 %v1150_v1  ;;  %v1149_v13 = vmax.f32 %v1085_v21, 0.0  ;;  %v1117_v22 = vadd.f32 %v2403_v50, %v1049_v45  ;;  %v1048_v4 = vmul.f32 %v2396_v31, %v2544_v24  ;;  %v1015_v55 = vmul.f32 %v2396_v31, %v2419_v39  ;;  %v3042_v1 = vld [vmem:[#allocation13_spill] sm:$0xff] }
 0x276   : > { %1248 = vmatpush.msrb.mxu2 %v1166_v47  ;;  %v1165_v48 = vmax.f32 %v1101_v40, 0.0  ;;  %v1084_v61 = vadd.f32 %v2403_v50, %v1016_v63  ;;  %v1031_v0 = vmul.f32 %v2396_v31, %v2480_v15  ;;  %1268 = vmatpush.msrb.mxu3 %v1182_v3  ;;  %v1100_v30 = vadd.f32 %v2403_v50, %v1032_v9  ;;  %v1208_v15 = vld [vmem:[%s2926_s4] sm:$0xff]  ;;  %v3043_v3 = vld [vmem:[#allocation12_spill] sm:$0xff] }
 0x277   : > { %1229 = vmatpush.msrb.mxu1 %v1149_v13  ;;  %v1181_v37 = vmax.f32 %v1117_v22, 0.0  ;;  %v1116_v18 = vadd.f32 %v2403_v50, %v1048_v4  ;;  %v1047_v24 = vmul.f32 %v2396_v31, %v2540_v20  ;;  %v1083_v33 = vadd.f32 %v2403_v50, %v1015_v55  ;;  %1210 = vst [vmem:[#allocation1] ss:$4 sm:$0xff] %v1208_v15  ;;  %v3044_v13 = vld [vmem:[#allocation23_spill] sm:$0xff] }
 0x278   : > { %1249 = vmatpush.msrb.mxu2 %v1165_v48  ;;  %v1148_v54 = vmax.f32 %v1084_v61, 0.0  ;;  %v1099_v8 = vadd.f32 %v2403_v50, %v1031_v0  ;;  %v1014_v39 = vmul.f32 %v2396_v31, %v2415_v58  ;;  %v1164_v62 = vmax.f32 %v1100_v30, 0.0  ;;  %v3045_v48 = vld [vmem:[#allocation11_spill] sm:$0xff]  ;;  %v1315_v30 = vld [vmem:[%s2927_s5 + $0x78] sm:$0xff] }
 0x279   : > { %1269 = vmatpush.msrb.mxu3 %v1181_v37  ;;  %v1180_v43 = vmax.f32 %v1116_v18, 0.0  ;;  %v1115_v26 = vadd.f32 %v2403_v50, %v1047_v24  ;;  %v1030_v20 = vmul.f32 %v2396_v31, %v2476_v11  ;;  %v1147_v12 = vmax.f32 %v1083_v33, 0.0  ;;  %v3046_v18 = vld [vmem:[#allocation9_spill] sm:$0xff]  ;;  %v1314_v15 = vld [vmem:[%s2927_s5 + $0x70] sm:$0xff] }
 0x27a   : > { %1230 = vmatpush.msrb.mxu1 %v1148_v54  ;;  %v1163_v56 = vmax.f32 %v1099_v8, 0.0  ;;  %v1082_v32 = vadd.f32 %v2403_v50, %v1014_v39  ;;  %v1046_v58 = vmul.f32 %v2396_v31, %v2536_v14  ;;  %1250 = vmatpush.msrb.mxu2 %v1164_v62  ;;  %v1013_v38 = vmul.f32 %v2396_v31, %v2411_v53  ;;  %v3047_v8 = vld [vmem:[#allocation10_spill] sm:$0xff]  ;;  %v3048_v62 = vld [vmem:[#allocation7_spill] sm:$0xff] }
 0x27b   : > { %1270 = vmatpush.msrb.mxu3 %v1180_v43  ;;  %v1179_v49 = vmax.f32 %v1115_v26, 0.0  ;;  %v1098_v6 = vadd.f32 %v2403_v50, %v1030_v20  ;;  %v1029_v11 = vmul.f32 %v2396_v31, %v2472_v36  ;;  %v1045_v44 = vmul.f32 %v2396_v31, %v2532_v41  ;;  %v3049_v26 = vld [vmem:[#allocation20_spill] sm:$0xff] }
 0x27c   : > { %1231 = vmatpush.msrb.mxu1 %v1147_v12  ;;  %v1146_v57 = vmax.f32 %v1082_v32, 0.0  ;;  %v1114_v10 = vadd.f32 %v2403_v50, %v1046_v58  ;;  %v1012_v14 = vmul.f32 %v2396_v31, %v2407_v16  ;;  %1251 = vmatpush.msrb.mxu2 %v1163_v56  ;;  %v1081_v2 = vadd.f32 %v2403_v50, %v1013_v38  ;;  %v3040_v16 = vld [vmem:[#allocation15_spill] sm:$0xff]  ;;  %v1313_v58 = vld [vmem:[%s2927_s5 + $0x68] sm:$0xff] }
 0x27d   : > { %1271 = vmatpush.msrb.mxu3 %v1179_v49  ;;  %v1162_v5 = vmax.f32 %v1098_v6, 0.0  ;;  %v1097_v53 = vadd.f32 %v2403_v50, %v1029_v11  ;;  %v1028_v36 = vmul.f32 %v2396_v31, %v2468_v23  ;;  %v1113_v29 = vadd.f32 %v2403_v50, %v1045_v44  ;;  %v3050_v49 = vld [vmem:[#allocation5_spill] sm:$0xff]  ;;  %v3051_v44 = vld [vmem:[#allocation4_spill] sm:$0xff] }
 0x27e   : > { %1232 = vmatpush.msrb.mxu1 %v1146_v57  ;;  %v1178_v28 = vmax.f32 %v1114_v10, 0.0  ;;  %v1080_v51 = vadd.f32 %v2403_v50, %v1012_v14  ;;  %v1044_v41 = vmul.f32 %v2396_v31, %v2528_v17  ;;  %v1002_v35 = vmul.f32 %v2391_v42, %v3040_v16  ;;  %v1212_v47 = vld.sshfl [vmem:[#allocation1 + $0x8] sm:$0xff pattern:$0x73625140]  ;;  %v1312_v10 = vld [vmem:[%s2927_s5 + $0x60] sm:$0xff] }
 0x27f   : > { %1252 = vmatpush.msrb.mxu2 %v1162_v5  ;;  %v1145_v7 = vmax.f32 %v1081_v2, 0.0  ;;  %v1161_v52 = vmax.f32 %v1097_v53, 0.0  ;;  %v1096_v46 = vadd.f32 %v2403_v50, %v1028_v36  ;;  %v1072_v23 = vmul.f32 %v2396_v31, %v3041_v34  ;;  %v1211_v4 = vld.sshfl [vmem:[#allocation1] sm:$0xff pattern:$0x73625140]  ;;  %v1311_v36 = vld [vmem:[%s2927_s5 + $0x58] sm:$0xff] }
 0x280   : > { %1272 = vmatpush.msrb.mxu3 %v1178_v28  ;;  %v1177_v19 = vmax.f32 %v1113_v29, 0.0  ;;  %v1112_v25 = vadd.f32 %v2403_v50, %v1044_v41  ;;  %v1142_v27 = vadd.f32 %v2403_v50, %v2637_v60  ;;  %v1001_v17 = vmul.f32 %v2391_v42, %v3042_v1  ;;  %v1213_v60 = vld.sshfl [vmem:[#allocation1 + $0x10] sm:$0xff pattern:$0x73625140]  ;;  %v3052_v28 = vld [vmem:[#allocation16_spill] sm:$0xff] }
 0x281   : > { %1233 = vmatpush.msrb.mxu1 %v1145_v7  ;;  %1253 = vmatpush.msrb.mxu2 %v1161_v52  ;;  %v1144_v21 = vmax.f32 %v1080_v51, 0.0  ;;  %v1160_v45 = vmax.f32 %v1096_v46, 0.0  ;;  %v1071_v40 = vmul.f32 %v2396_v31, %v3043_v3  ;;  %v1207_v22 = vmax.f32 %v3044_v13, 0.0  ;;  %v3053_v7 = vld [vmem:[#allocation14_spill] sm:$0xff] }
 0x282   : > { %1273 = vmatpush.msrb.mxu3 %v1177_v19  ;;  %v1176_v63 = vmax.f32 %v1112_v25, 0.0  ;;  %v1141_v9 = vadd.f32 %v2403_v50, %v2616_v59  ;;  %v1000_v61 = vmul.f32 %v2391_v42, %v3045_v48  ;;  %v1070_v55 = vmul.f32 %v2396_v31, %v1002_v35  ;;  %v1310_v35 = vld [vmem:[%s2927_s5 + $0x50] sm:$0xff]  ;;  %v1309_v19 = vld [vmem:[%s2927_s5 + $0x48] sm:$0xff]  ;;  %v1214_v48 = vld.sshfl [vmem:[#allocation1 + $0x18] sm:$0xff pattern:$0x73625140] }
 0x283   : > { %1234 = vmatpush.msrb.mxu1 %v1144_v21  ;;  %1254 = vmatpush.msrb.mxu2 %v1160_v45  ;;  %v1206_v0 = vmax.f32 %v1142_v27, 0.0  ;;  %v1140_v37 = vadd.f32 %v2403_v50, %v1072_v23  ;;  %v999_v59 = vmul.f32 %v2391_v42, %v3046_v18  ;;  %v1069_v24 = vmul.f32 %v2396_v31, %v1001_v17 }
 0x284   : > { %1274 = vmatpush.msrb.mxu3 %v1176_v63  ;;  %1255 = vmatmul.f32.vlgmr.msrb.gmra.mxu2 %v1212_v47  ;;  %v1205_v54 = vmax.f32 %v1141_v9, 0.0  ;;  %v1139_v33 = vadd.f32 %v2403_v50, %v1071_v40  ;;  %v2765_v39 = vadd.f32 %v2403_v50, %v3047_v8  ;;  %v2772_v43 = vadd.f32 %v2403_v50, %v3048_v62  ;;  %v1307_v47 = vld [vmem:[%s2927_s5 + $0x38] sm:$0xff]  ;;  %v1306_v63 = vld [vmem:[%s2927_s5 + $0x30] sm:$0xff] }
 0x285   : > { %1279 = vmatpush.msra.mxu1 %v1207_v22  ;;  %1275 = vmatmul.f32.vlgmr.msrb.gmra.mxu3 %v1213_v60  ;;  %v998_v20 = vmul.f32 %v2391_v42, %v3049_v26  ;;  %v1068_v12 = vmul.f32 %v2396_v31, %v1000_v61  ;;  %v1204_v56 = vmax.f32 %v1140_v37, 0.0  ;;  %v1138_v32 = vadd.f32 %v2403_v50, %v1070_v55  ;;  %v1305_v61 = vld [vmem:[%s2927_s5 + $0x28] sm:$0xff]  ;;  %v1303_v55 = vld [vmem:[%s2927_s5 + $0x18] sm:$0xff] }
 0x286   : > { %1235 = vmatmul.f32.vlgmr.msrb.gmra.mxu1 %v1211_v4  ;;  %1316 = vmatpush.msra.mxu2 %v1315_v30  ;;  %v997_v6 = vmul.f32 %v2391_v42, %v3050_v49  ;;  %v1067_v38 = vmul.f32 %v2396_v31, %v999_v59  ;;  %v1203_v11 = vmax.f32 %v1139_v33, 0.0  ;;  %v1137_v57 = vadd.f32 %v2403_v50, %v1069_v24  ;;  %v1301_v37 = vld [vmem:[%s2927_s5 + $0x8] sm:$0xff]  ;;  %v1300_v30 = vld [vmem:[%s2927_s5] sm:$0xff] }
 0x287   : > { %1280 = vmatpush.msra.mxu1 %v1206_v0  ;;  %v996_v14 = vmul.f32 %v2391_v42, %v3051_v44  ;;  %v1066_v5 = vmul.f32 %v2396_v31, %v998_v20  ;;  %v1202_v2 = vmax.f32 %v1138_v32, 0.0  ;;  %v1136_v53 = vadd.f32 %v2403_v50, %v1068_v12  ;;  %v1302_v0 = vld [vmem:[%s2927_s5 + $0x10] sm:$0xff] }
 0x288   : > { %1317 = vmatpush.msra.mxu2 %v1314_v15  ;;  %v995_v29 = vmul.f32 %v2391_v42, %v3052_v28  ;;  %v1065_v51 = vmul.f32 %v2396_v31, %v997_v6  ;;  %v1201_v41 = vmax.f32 %v1137_v57, 0.0  ;;  %v1135_v16 = vadd.f32 %v2403_v50, %v1067_v38 }
 0x289   : > { %1281 = vmatpush.msra.mxu1 %v1205_v54  ;;  %v994_v52 = vmul.f32 %v2391_v42, %v3053_v7  ;;  %v1064_v46 = vmul.f32 %v2396_v31, %v996_v14  ;;  %v1200_v34 = vmax.f32 %v1136_v53, 0.0  ;;  %v1134_v23 = vadd.f32 %v2403_v50, %v1066_v5  ;;  %v1308_v42 = vld [vmem:[%s2927_s5 + $0x40] sm:$0xff]  ;;  %v1398_v7 = vld [vmem:[%s2930_s8 + $0x68] sm:$0xff] }
 0x28a   : > { %1318 = vmatpush.msra.mxu2 %v1313_v58  ;;  %v1063_v25 = vmul.f32 %v2396_v31, %v995_v29  ;;  %v1199_v27 = vmax.f32 %v1135_v16, 0.0  ;;  %v1133_v1 = vadd.f32 %v2403_v50, %v1065_v51  ;;  %v1193_v4 = vmax.f32 %v2765_v39, 0.0  ;;  %v1399_v16 = vld [vmem:[%s2930_s8 + $0x70] sm:$0xff] }
 0x28b   : > { %1282 = vmatpush.msra.mxu1 %v1204_v56  ;;  %v1062_v17 = vmul.f32 %v2396_v31, %v994_v52  ;;  %v1198_v21 = vmax.f32 %v1134_v23, 0.0  ;;  %v1132_v45 = vadd.f32 %v2403_v50, %v1064_v46  ;;  %v1192_v60 = vmax.f32 %v2772_v43, 0.0  ;;  %v1397_v46 = vld [vmem:[%s2930_s8 + $0x60] sm:$0xff]  ;;  %v1396_v23 = vld [vmem:[%s2930_s8 + $0x58] sm:$0xff] }
 0x28c   : > { %1319 = vmatpush.msra.mxu2 %v1312_v10  ;;  %v1197_v3 = vmax.f32 %v1133_v1, 0.0  ;;  %v1131_v40 = vadd.f32 %v2403_v50, %v1063_v25  ;;  %v1629_v15 = vmov 2.0   ;;  %v1394_v25 = vld [vmem:[%s2930_s8 + $0x48] sm:$0xff] }
 0x28d   : > { %1283 = vmatpush.msra.mxu1 %v1203_v11  ;;  %v1196_v31 = vmax.f32 %v1132_v45, 0.0  ;;  %v1130_v13 = vadd.f32 %v2403_v50, %v1062_v17  ;;  %v1304_v50 = vld [vmem:[%s2927_s5 + $0x20] sm:$0xff]  ;;  %1614 = vrcp.f32 %v1629_v15 }
 0x28e   : > { %1320 = vmatpush.msra.mxu2 %v1311_v36  ;;  %v1195_v22 = vmax.f32 %v1131_v40, 0.0  ;;  %v1389_v40 = vld [vmem:[%s2930_s8 + $0x20] sm:$0xff] }
 0x28f   : > { %1284 = vmatpush.msra.mxu1 %v1202_v2  ;;  %v1194_v9 = vmax.f32 %v1130_v13, 0.0 }
 0x290   : > { %1321 = vmatpush.msra.mxu2 %v1310_v35 }
 0x291   : > { %1285 = vmatpush.msra.mxu1 %v1201_v41  ;;  %v1400_v41 = vld [vmem:[%s2930_s8 + $0x78] sm:$0xff] }
 0x292   : > { %1322 = vmatpush.msra.mxu2 %v1309_v19  ;;  %1401 = vmatpush.msra.mxu3 %v1400_v41  ;;  %v1395_v19 = vld [vmem:[%s2930_s8 + $0x50] sm:$0xff] }
 0x293   : > { %1286 = vmatpush.msra.mxu1 %v1200_v34  ;;  %v1615_v62 = vpop.eup %1614 }
 0x294   : > { %1323 = vmatpush.msra.mxu2 %v1308_v42  ;;  %v1345_v43 = vmul.f32 2.0, %v1615_v62  ;;  %vm1349_vm5 = vweird.f32 %v1615_v62  ;;  %1402 = vmatpush.msra.mxu3 %v1399_v16  ;;  %v1392_v42 = vld [vmem:[%s2930_s8 + $0x38] sm:$0xff] }
 0x295   : > { %1287 = vmatpush.msra.mxu1 %v1199_v27  ;;  %v1393_v27 = vld [vmem:[%s2930_s8 + $0x40] sm:$0xff] }
 0x296   : > { %1324 = vmatpush.msra.mxu2 %v1307_v47  ;;  %v1346_v26 = vsub.f32 1.0, %v1345_v43  ;;  %1403 = vmatpush.msra.mxu3 %v1398_v7  ;;  %v1390_v47 = vld [vmem:[%s2930_s8 + $0x28] sm:$0xff] }
 0x297   : > { %1288 = vmatpush.msra.mxu1 %v1198_v21  ;;  %v1391_v21 = vld [vmem:[%s2930_s8 + $0x30] sm:$0xff] }
 0x298   : > { %1325 = vmatpush.msra.mxu2 %v1306_v63  ;;  %v1347_v32 = vmul.f32 %v1615_v62, %v1346_v26  ;;  %1404 = vmatpush.msra.mxu3 %v1397_v46 }
 0x299   : > { %1289 = vmatpush.msra.mxu1 %v1197_v3 }
 0x29a   : > { %1326 = vmatpush.msra.mxu2 %v1305_v61  ;;  %v1348_v6 = vadd.f32 %v1615_v62, %v1347_v32  ;;  %1405 = vmatpush.msra.mxu3 %v1396_v23  ;;  %v1386_v61 = vld [vmem:[%s2930_s8 + $0x8] sm:$0xff] }
 0x29b   : > { %1290 = vmatpush.msra.mxu1 %v1196_v31  ;;  %v1388_v31 = vld [vmem:[%s2930_s8 + $0x18] sm:$0xff] }
 0x29c   : > { %1327 = vmatpush.msra.mxu2 %v1304_v50  ;;  %v2851_v57 = vsel %vm1349_vm5, %v1615_v62, %v1348_v6  ;;  %1406 = vmatpush.msra.mxu3 %v1395_v19 }
 0x29d   : > { %1291 = vmatpush.msra.mxu1 %v1195_v22  ;;  %v1608_v22 = vld [vmem:[%s2928_s6] ss:$0 sm:$0xff] }
 0x29e   : > { %1328 = vmatpush.msra.mxu2 %v1303_v55  ;;  %1407 = vmatpush.msra.mxu3 %v1394_v25  ;;  %v1385_v55 = vld [vmem:[%s2930_s8] sm:$0xff] }
 0x29f   : > { %1292 = vmatpush.msra.mxu1 %v1194_v9  ;;  %v1387_v9 = vld [vmem:[%s2930_s8 + $0x10] sm:$0xff] }
 0x2a0   : > { %1329 = vmatpush.msra.mxu2 %v1302_v0  ;;  %1408 = vmatpush.msra.mxu3 %v1393_v27 }
 0x2a1   : > { %1293 = vmatpush.msra.mxu1 %v1193_v4 }
 0x2a2   : > { %1330 = vmatpush.msra.mxu2 %v1301_v37  ;;  %1409 = vmatpush.msra.mxu3 %v1392_v42 }
 0x2a3   : > { %1294 = vmatpush.msra.mxu1 %v1192_v60 }
 0x2a4   : > { %1295 = vmatmul.f32.vlgmr.msra.gmra.mxu1 %v1214_v48  ;;  %1331 = vmatpush.msra.mxu2 %v1300_v30  ;;  %v1609_v48 = vld [vmem:[%s2929_s7] ss:$0 sm:$0xff] }
 0x2a5   : > { %1410 = vmatpush.msra.mxu3 %v1391_v21 }
 0x2a7   : > { %1411 = vmatpush.msra.mxu3 %v1390_v47 }
 0x2a9   : > { %1412 = vmatpush.msra.mxu3 %v1389_v40 }
 0x2ab   : > { %1413 = vmatpush.msra.mxu3 %v1388_v31 }
 0x2ad   : > { %1414 = vmatpush.msra.mxu3 %v1387_v9 }
 0x2af   : > { %1415 = vmatpush.msra.mxu3 %v1386_v61 }
 0x2b1   : > { %1416 = vmatpush.msra.mxu3 %v1385_v55 }
 0x303   : > { %v1236_v18 = vpop.f32.mrf.mxu1 }
 0x307   : > { %v1256_v59 = vpop.f32.mrf.mxu2 }
 0x308   : > { %v1257_v24 = vadd.f32 %v1256_v59, %v1236_v18  ;;  %v1276_v54 = vpop.f32.mrf.mxu3 }
 0x30a   : > { %v1277_v33 = vadd.f32 %v1276_v54, %v1257_v24 }
 0x321   : > { %v1296_v8 = vpop.f32.mrf.mxu1 }
 0x322   : > { %v1297_v39 = vadd.f32 %v1296_v8, %v1277_v33 }
 0x324   : > { %1299 = vst [vmem:[%s364_s20] sm:$0x3] %v1297_v39  ;;  %1332 = vmatmul.f32.vlgmr.msra.gmra.mxu2 %v1297_v39 }
 0x3a7   : > { %v1333_v20 = vpop.f32.mrf.mxu2 }
 0x3a8   : > { %v1337_v12 = vsel %vm1336_vm4, %v1333_v20, 0.0 }
 0x3a9   : > { %v1338_v56 = vrot.slane %v1337_v12, 4 }
 0x3ab   : > { %v1339_v58 = vadd.f32 %v1338_v56, %v1337_v12 }
 0x3ad   : > { %v1340_v49 = vrot.slane %v1339_v58, 2 }
 0x3af   : > { %v1341_v38 = vadd.f32 %v1340_v49, %v1339_v58 }
 0x3b1   : > { %v1342_v11 = vrot.slane %v1341_v38, 1 }
 0x3b3   : > { %v1343_v10 = vadd.f32 %v1342_v11, %v1341_v38 }
 0x3b5   : > { %v1351_v44 = vmul.f32 %v2851_v57, %v1343_v10 }
 0x3b7   : > { %v1352_v14 = vsub.f32 %v1333_v20, %v1351_v44 }
 0x3b9   : > { %v1353_v5 = vmul.f32 %v1352_v14, %v1352_v14 }
 0x3bb   : > { %v1354_v2 = vsel %vm1336_vm4, %v1353_v5, 0.0 }
 0x3bc   : > { %v1355_v53 = vrot.slane %v1354_v2, 4 }
 0x3be   : > { %v1356_v36 = vadd.f32 %v1355_v53, %v1354_v2 }
 0x3c0   : > { %v1357_v28 = vrot.slane %v1356_v36, 2 }
 0x3c2   : > { %v1358_v29 = vadd.f32 %v1357_v28, %v1356_v36 }
 0x3c4   : > { %v1359_v51 = vrot.slane %v1358_v29, 1 }
 0x3c6   : > { %v1360_v35 = vadd.f32 %v1359_v51, %v1358_v29 }
 0x3c8   : > { %v1361_v52 = vmul.f32 %v1360_v35, %v2851_v57 }
 0x3ca   : > { %v1362_v34 = vadd.f32 1e-05, %v1361_v52 }
 0x3cc   : > { %1616 = vrsqrt.f32 %v1362_v34  ;;  %vm1369_vm7 = vweird.f32 %v1362_v34 }
 0x3d2   : > { %v1617_v1 = vpop.eup %1616 }
 0x3d3   : > { %v1364_v17 = vmul.f32 %v1617_v1, %v1362_v34  ;;  %vm1370_vm6 = vweird.f32 %v1617_v1 }
 0x3d4   : > { %vm1371_vm8 = vmor %vm1369_vm7, %vm1370_vm6 }
 0x3d5   : > { %v1365_v45 = vmul.f32 %v1617_v1, %v1364_v17 }
 0x3d7   : > { %v1366_v3 = vmul.f32 0.5, %v1365_v45 }
 0x3d9   : > { %v1367_v63 = vsub.f32 1.5, %v1366_v3 }
 0x3db   : > { %v1368_v13 = vmul.f32 %v1617_v1, %v1367_v63 }
 0x3dd   : > { %v1372_v4 = vsel %vm1371_vm8, %v1617_v1, %v1368_v13 }
 0x3de   : > { %v1373_v60 = vmul.f32 %v1372_v4, %v1352_v14 }
 0x3e0   : > { %v1378_v50 = vmul.f32 %v1608_v22, %v1373_v60 }
 0x3e2   : > { %v1383_v0 = vadd.f32 %v1609_v48, %v1378_v50 }
 0x3e4   : > { %v1384_v37 = vmax.f32 %v1383_v0, 0.0 }
 0x3e6   : > { %1417 = vmatmul.f32.vlgmr.msra.gmra.mxu3 %v1384_v37 }
 0x469   : > { %v1418_v30 = vpop.f32.mrf.mxu3 }
 0x46a   : > { %v1421_v18 = vsel %vm1336_vm4, %v1418_v30, 0.0 }
 0x46b   : > { %v1422_v59 = vrot.slane %v1421_v18, 4 }
 0x46d   : > { %v1423_v24 = vadd.f32 %v1422_v59, %v1421_v18 }
 0x46f   : > { %v1424_v54 = vrot.slane %v1423_v24, 2 }
 0x471   : > { %v1425_v33 = vadd.f32 %v1424_v54, %v1423_v24 }
 0x473   : > { %v1426_v8 = vrot.slane %v1425_v33, 1 }
 0x475   : > { %v1427_v39 = vadd.f32 %v1426_v8, %v1425_v33 }
 0x477   : > { %v1428_v15 = vmul.f32 %v1427_v39, %v2851_v57 }
 0x479   : > { %v1429_v62 = vsub.f32 %v1418_v30, %v1428_v15 }
 0x47b   : > { %v1430_v43 = vmul.f32 %v1429_v62, %v1429_v62 }
 0x47d   : > { %v1431_v26 = vsel %vm1336_vm4, %v1430_v43, 0.0 }
 0x47e   : > { %v1432_v20 = vrot.slane %v1431_v26, 4 }
 0x480   : > { %v1433_v12 = vadd.f32 %v1432_v20, %v1431_v26 }
 0x482   : > { %v1434_v56 = vrot.slane %v1433_v12, 2 }
 0x484   : > { %v1435_v32 = vadd.f32 %v1434_v56, %v1433_v12 }
 0x486   : > { %v1436_v58 = vrot.slane %v1435_v32, 1 }
 0x488   : > { %v1437_v49 = vadd.f32 %v1436_v58, %v1435_v32 }
 0x48a   : > { %v1438_v6 = vmul.f32 %v1437_v49, %v2851_v57 }
 0x48c   : > { %v1439_v38 = vadd.f32 1e-05, %v1438_v6 }
 0x48e   : > { %1618 = vrsqrt.f32 %v1439_v38  ;;  %vm1446_vm10 = vweird.f32 %v1439_v38 }
 0x494   : > { %v1619_v11 = vpop.eup %1618 }
 0x495   : > { %v1441_v10 = vmul.f32 %v1619_v11, %v1439_v38  ;;  %vm1447_vm9 = vweird.f32 %v1619_v11 }
 0x496   : > { %vm1448_vm11 = vmor %vm1446_vm10, %vm1447_vm9 }
 0x497   : > { %v1442_v44 = vmul.f32 %v1619_v11, %v1441_v10 }
 0x499   : > { %v1443_v14 = vmul.f32 0.5, %v1442_v44 }
 0x49b   : > { %v1444_v5 = vsub.f32 1.5, %v1443_v14 }
 0x49d   : > { %v1445_v2 = vmul.f32 %v1619_v11, %v1444_v5 }
 0x49f   : > { %v1449_v53 = vsel %vm1448_vm11, %v1619_v11, %v1445_v2 }
 0x4a0   : > { %v1450_v36 = vmul.f32 %v1449_v53, %v1429_v62 }
 0x4a2   : > { %1451 = vst [vmem:[%s368_s25] sm:$0x3] %v1450_v36 }
 0x4a3 PF: > { %s21_s13 = sadd.s32 1, %s1626_s13  }
 0x4a4   : > { %p18_p4 = scmp.ge.s32.totalorder %s21_s13, 4  }
 0x4a6   :  { %20 = sbr.rel (!%p18_p4) target bundleno = 1 (0x1), region = 98 }

</bundles_post_ra>
